<compile_context>
chip_gen: v7x
topology: tpu7x:2x2x1
jax: 0.10.0
libtpu: 0.0.40
codegen_flags: <defaults>
</compile_context>

<pallas_src>
import math
from functools import partial

import jax
import jax.numpy as jnp
from jax.experimental import pallas as pl
from jax.experimental.pallas import tpu as pltpu


# ----------------------------------------------------------------------------
# Shared GRU cell (values, not refs).  gx: (B,3H) f32 with b_ih + b_hr/b_hz folded,
# h: (B,H) f32, whh: (H,3H) bf16 = [W_hr|W_hz|W_hn]^T, bhn: (B,H) f32.
# ----------------------------------------------------------------------------
def _gru_cell(gx, h, whh, bhn, H):
    gh = jnp.dot(h.astype(whh.dtype), whh, preferred_element_type=jnp.float32)
    rz = jax.nn.sigmoid(gx[:, :2 * H] + gh[:, :2 * H])
    r = rz[:, :H]
    z = rz[:, H:]
    n = jnp.tanh(gx[:, 2 * H:] + r * (gh[:, 2 * H:] + bhn))
    return n + z * (h - n)          # == (1 - z) * n + z * h


def _unroll_for(Tc):
    # Partial unroll lets the LLO scheduler overlap gx loads / out stores with the
    # MXU/EUP latency of the dependent recurrence chain.
    if Tc <= 32:
        return True
    for u in (8, 4, 2):
        if Tc % u == 0:
            return u
    return 1


# ----------------------------------------------------------------------------
# Kernel A (v7x path): one direction per grid step.  grid = (2, n_tc).
# Hidden state carried across T-chunks in a VMEM scratch.
# ----------------------------------------------------------------------------
def _bigru_split_kernel(gx_ref, whh_ref, bhn_ref, out_ref, h_ref):
    d = pl.program_id(0)              # 0 = forward, 1 = backward
    tc = pl.program_id(1)             # chunk index (already reversed for bwd by index_map)
    Tc, B, H3 = gx_ref.shape
    H = H3 // 3

    @pl.when(tc == 0)
    def _():
        h_ref[...] = jnp.zeros_like(h_ref)

    bhn = jnp.broadcast_to(bhn_ref[...], (B, H))      # hoisted out of the time loop

    def step(s, h):
        t = s + d * (Tc - 1 - 2 * s)                  # fwd: s ; bwd: Tc-1-s
        h_new = _gru_cell(gx_ref[t], h, whh_ref[...], bhn, H)
        out_ref[t] = h_new.astype(out_ref.dtype)
        return h_new

    h_ref[...] = jax.lax.fori_loop(0, Tc, step, h_ref[...], unroll=_unroll_for(Tc))


# ----------------------------------------------------------------------------
# Kernel B (v5e/v6e path): both directions interleaved per grid step. grid=(n_tc,).
# Two independent recurrence chains hide each other's MXU/EUP latency.
# ----------------------------------------------------------------------------
def _bigru_interleaved_kernel(gxf_ref, gxb_ref, whh_ref, bhn_ref,
                              outf_ref, outb_ref, hf_ref, hb_ref):
    tc = pl.program_id(0)
    Tc, B, H3 = gxf_ref.shape
    H = H3 // 3

    @pl.when(tc == 0)
    def _():
        hf_ref[...] = jnp.zeros_like(hf_ref)
        hb_ref[...] = jnp.zeros_like(hb_ref)

    bhn_f = jnp.broadcast_to(bhn_ref[0], (B, H))
    bhn_b = jnp.broadcast_to(bhn_ref[1], (B, H))

    def step(s, carry):
        hf, hb = carry
        tb = Tc - 1 - s                               # bwd walks its (reversed) chunk backwards
        hf_new = _gru_cell(gxf_ref[s], hf, whh_ref[0], bhn_f, H)
        hb_new = _gru_cell(gxb_ref[tb], hb, whh_ref[1], bhn_b, H)
        outf_ref[s] = hf_new.astype(outf_ref.dtype)
        outb_ref[tb] = hb_new.astype(outb_ref.dtype)
        return hf_new, hb_new

    hf_fin, hb_fin = jax.lax.fori_loop(0, Tc, step, (hf_ref[...], hb_ref[...]),
                                       unroll=_unroll_for(Tc))
    hf_ref[...] = hf_fin
    hb_ref[...] = hb_fin


# ----------------------------------------------------------------------------
# Chunk sizing: keep double-buffered gx + out chunk blocks well under the v5e
# 16 MiB default scoped VMEM and the v7x 64 MiB per-TensorCore total.
# ----------------------------------------------------------------------------
def _choose_tchunk(T, B, H, interleaved):
    per_step = (3 * H + H) * B * 4 * 2        # gx row + out row, f32, double-buffered
    if interleaved:
        per_step *= 2                          # both directions per invocation
    budget = 8 * 1024 * 1024
    tc_max = int(max(1, min(512, budget // max(per_step, 1))))
    if T <= tc_max:
        return T
    best = 1
    for c in range(2, tc_max + 1):
        if T % c == 0:
            best = c
    return best


def _num_tensorcores_per_chip():
    # v7x has 2 TensorCores per chip ("parallel" grid axis splits across them);
    # v5e / v6e have 1.  Default to 1 (interleaved kernel) when unsure.
    try:
        kind = jax.local_devices()[0].device_kind.lower()
    except Exception:
        return 1
    return 2 if ("v7" in kind or "tpu7" in kind) else 1


# ----------------------------------------------------------------------------
# One bidirectional GRU layer. h_tbd: (T, B, D_in) f32 -> (T, B, 2H) f32.
# ----------------------------------------------------------------------------
def _bigru_layer(h_tbd, layer_params, *, split_directions, t_chunk=None):
    (wih_f, whh_f, bih_f, bhh_f, wih_b, whh_b, bih_b, bhh_b) = layer_params
    T, B, _ = h_tbd.shape
    H = whh_f.shape[1]
    H3 = 3 * H

    def fold_bias(b_ih, b_hh):
        # b_hr / b_hz fold into the input-side bias; b_hn cannot (it is scaled by r).
        return b_ih + jnp.concatenate([b_hh[:2 * H], jnp.zeros((H,), b_hh.dtype)])

    # Only the (tiny) weights are stacked; the big gx activation is produced already
    # stacked by a single einsum (no post-hoc activation stack / HBM copy).
    wih_all = jnp.stack([wih_f, wih_b])                                    # (2,3H,D)
    bias_all = jnp.stack([fold_bias(bih_f, bhh_f), fold_bias(bih_b, bhh_b)])   # (2,3H)
    whh_all = jnp.stack([whh_f.T, whh_b.T]).astype(jnp.bfloat16)           # (2,H,3H) bf16
    bhn_all = jnp.stack([bhh_f[2 * H:], bhh_b[2 * H:]])[:, None, :]        # (2,1,H) f32

    # Hoisted input projection for ALL timesteps & both directions: one large,
    # fully time-parallel MXU matmul done by XLA, kept OFF the serial recurrence.
    gx_all = (jnp.einsum("tbd,cgd->ctbg", h_tbd, wih_all,
                         preferred_element_type=jnp.float32)
              + bias_all[:, None, None, :])                                # (2,T,B,3H) f32

    Tc = (_choose_tchunk(T, B, H, interleaved=not split_directions)
          if t_chunk is None else t_chunk)
    assert T % Tc == 0, (T, Tc)
    n_tc = T // Tc

    cparams = pltpu.CompilerParams(
        dimension_semantics=(("parallel", "arbitrary") if split_directions
                             else ("arbitrary",)),
        vmem_limit_bytes=32 * 1024 * 1024)

    if split_directions:
        # ---- v7x path: direction axis "parallel" across the 2 TensorCores ----
        def tmap(d, tc):
            # forward reads chunk tc; backward reads chunk n_tc-1-tc (reverse order)
            return tc + d * (n_tc - 1 - 2 * tc)

        gx_spec = pl.BlockSpec((None, Tc, B, H3), lambda d, tc: (d, tmap(d, tc), 0, 0))
        whh_spec = pl.BlockSpec((None, H, H3), lambda d, tc: (d, 0, 0))
        bhn_spec = pl.BlockSpec((None, 1, H), lambda d, tc: (d, 0, 0))

        direct_out = (H % 128 == 0)
        if direct_out:
            # Write straight into the (T, B, 2H) activation: fwd half at lane-block 0,
            # bwd half at lane-block 1 -> no per-layer concat HBM copy.
            out_shape = jax.ShapeDtypeStruct((T, B, 2 * H), jnp.float32)
            out_spec = pl.BlockSpec((Tc, B, H), lambda d, tc: (tmap(d, tc), 0, d))
        else:
            out_shape = jax.ShapeDtypeStruct((2, T, B, H), jnp.float32)
            out_spec = pl.BlockSpec((None, Tc, B, H),
                                    lambda d, tc: (d, tmap(d, tc), 0, 0))

        out = pl.pallas_call(
            _bigru_split_kernel,
            out_shape=out_shape,
            grid_spec=pltpu.PrefetchScalarGridSpec(
                num_scalar_prefetch=0,
                grid=(2, n_tc),
                in_specs=[gx_spec, whh_spec, bhn_spec],
                out_specs=out_spec,
                scratch_shapes=[pltpu.VMEM((B, H), jnp.float32)]),
            compiler_params=cparams,
        )(gx_all, whh_all, bhn_all)
        if direct_out:
            return out
        return jnp.concatenate([out[0], out[1]], axis=-1)

    # ---- v5e / v6e path: single TensorCore, fwd/bwd interleaved in one kernel ----
    gxf_spec = pl.BlockSpec((None, Tc, B, H3), lambda tc: (0, tc, 0, 0))
    gxb_spec = pl.BlockSpec((None, Tc, B, H3), lambda tc: (1, n_tc - 1 - tc, 0, 0))
    whh_spec = pl.BlockSpec((2, H, H3), lambda tc: (0, 0, 0))
    bhn_spec = pl.BlockSpec((2, 1, H), lambda tc: (0, 0, 0))
    outf_spec = pl.BlockSpec((Tc, B, H), lambda tc: (tc, 0, 0))
    outb_spec = pl.BlockSpec((Tc, B, H), lambda tc: (n_tc - 1 - tc, 0, 0))

    out_f, out_b = pl.pallas_call(
        _bigru_interleaved_kernel,
        out_shape=(jax.ShapeDtypeStruct((T, B, H), jnp.float32),
                   jax.ShapeDtypeStruct((T, B, H), jnp.float32)),
        grid_spec=pltpu.PrefetchScalarGridSpec(
            num_scalar_prefetch=0,
            grid=(n_tc,),
            in_specs=[gxf_spec, gxb_spec, whh_spec, bhn_spec],
            out_specs=(outf_spec, outb_spec),
            scratch_shapes=[pltpu.VMEM((B, H), jnp.float32),
                            pltpu.VMEM((B, H), jnp.float32)]),
        compiler_params=cparams,
    )(gx_all, gx_all, whh_all, bhn_all)
    return jnp.concatenate([out_f, out_b], axis=-1)


# ----------------------------------------------------------------------------
# BiDIRARTangled forward: stacked bidirectional GRU, batch_first I/O.
# ----------------------------------------------------------------------------
@partial(jax.jit, static_argnames=("split_directions", "t_chunk"))
def _forward_impl(x_btd, params, split_directions, t_chunk):
    B, T, _ = x_btd.shape
    h = jnp.transpose(x_btd, (1, 0, 2)).astype(jnp.float32)   # time-major (T,B,D)
    # Pad batch to a sublane multiple (8).  Padded rows never mix with real rows
    # (no cross-batch interaction in a GRU) and are sliced off at the end.
    B_pad = -(-B // 8) * 8
    if B_pad != B:
        h = jnp.pad(h, ((0, 0), (0, B_pad - B), (0, 0)))
    for layer_params in params:
        h = _bigru_layer(h, layer_params, split_directions=split_directions,
                         t_chunk=t_chunk)
    return jnp.transpose(h[:, :B], (1, 0, 2))                 # (B, T, 2H)


def bidir_ar_tangled_forward(x_btd, params, split_directions=None, t_chunk=None):
    """x_btd: (B, T, dimEncoded) -> (B, T, dimOutput)."""
    # TODO(synk): nn.GRU.flatten_parameters() is a cuDNN memory-layout hint; no TPU
    # equivalent (no-op here).
    if split_directions is None:
        split_directions = _num_tensorcores_per_chip() >= 2
    return _forward_impl(x_btd, params, split_directions=split_directions,
                         t_chunk=t_chunk)


# ----------------------------------------------------------------------------
# Deterministic parameter init (PyTorch GRU shapes & U(-1/sqrt(H), 1/sqrt(H)))
# ----------------------------------------------------------------------------
def init_params(key, dim_encoded, dim_output, n_levels):
    assert dim_output % 2 == 0
    H = dim_output // 2
    bound = 1.0 / math.sqrt(H)
    params = []
    for layer in range(n_levels):
        d_in = dim_encoded if layer == 0 else 2 * H
        layer_p = []
        for _direction in range(2):  # forward, reverse
            key, k1, k2, k3, k4 = jax.random.split(key, 5)
            w_ih = jax.random.uniform(k1, (3 * H, d_in), jnp.float32, -bound, bound)
            w_hh = jax.random.uniform(k2, (3 * H, H), jnp.float32, -bound, bound)
            b_ih = jax.random.uniform(k3, (3 * H,), jnp.float32, -bound, bound)
            b_hh = jax.random.uniform(k4, (3 * H,), jnp.float32, -bound, bound)
            layer_p += [w_ih, w_hh, b_ih, b_hh]
        params.append(tuple(layer_p))
    return params


# ----------------------------------------------------------------------------
# Pure-JAX f32 reference (lax.scan) for correctness checks
# ----------------------------------------------------------------------------
def _ref_gru_dir(x_tbd, w_ih, w_hh, b_ih, b_hh):
    H = w_hh.shape[1]
    B = x_tbd.shape[1]

    def step(h, x_t):
        gx = x_t @ w_ih.T + b_ih
        gh = h @ w_hh.T + b_hh
        r = jax.nn.sigmoid(gx[:, :H] + gh[:, :H])
        z = jax.nn.sigmoid(gx[:, H:2 * H] + gh[:, H:2 * H])
        n = jnp.tanh(gx[:, 2 * H:] + r * gh[:, 2 * H:])
        h_new = (1.0 - z) * n + z * h
        return h_new, h_new

    h0 = jnp.zeros((B, H), jnp.float32)
    _, ys = jax.lax.scan(step, h0, x_tbd)
    return ys


def _ref_forward(x_btd, params):
    h = jnp.transpose(x_btd, (1, 0, 2))
    for (wih_f, whh_f, bih_f, bhh_f, wih_b, whh_b, bih_b, bhh_b) in params:
        out_f = _ref_gru_dir(h, wih_f, whh_f, bih_f, bhh_f)
        out_b = _ref_gru_dir(h[::-1], wih_b, whh_b, bih_b, bhh_b)[::-1]
        h = jnp.concatenate([out_f, out_b], axis=-1)
    return jnp.transpose(h, (1, 0, 2))


if __name__ == "__main__":
    key = jax.random.PRNGKey(0)

    # --- main demo: dimEncoded=16, dimOutput=32, 2 GRU levels, B=2, T=8 ---
    B, T = 2, 8
    dim_encoded, dim_output, n_levels = 16, 32, 2
    key, kx = jax.random.split(key)
    x = jax.random.normal(kx, (B, T, dim_encoded), jnp.float32)
    params = init_params(key, dim_encoded, dim_output, n_levels)

    out = jax.block_until_ready(bidir_ar_tangled_forward(x, params))
    assert out.shape == (B, T, dim_output), out.shape
    ref = jax.block_until_ready(_ref_forward(x, params))
    err = float(jnp.max(jnp.abs(out - ref)))
    assert err < 5e-2, f"main path err={err}"      # bf16 MXU operands -> looser than f32

    # --- exercise both kernel paths + chunked hidden-state carry (n_tc > 1) ---
    for split in (False, True):
        o = jax.block_until_ready(
            bidir_ar_tangled_forward(x, params, split_directions=split, t_chunk=4))
        e = float(jnp.max(jnp.abs(o - ref)))
        assert e < 5e-2, f"split={split} err={e}"

    # --- lane-aligned H=128 (direct (T,B,2H) output write) + odd batch padding ---
    B2, T2 = 3, 16
    de2, do2 = 24, 256                              # H = 128
    key, kx2 = jax.random.split(key)
    x2 = jax.random.normal(kx2, (B2, T2, de2), jnp.float32)
    params2 = init_params(key, de2, do2, 1)
    ref2 = jax.block_until_ready(_ref_forward(x2, params2))
    for split in (False, True):
        o2 = jax.block_until_ready(
            bidir_ar_tangled_forward(x2, params2, split_directions=split, t_chunk=8))
        e2 = float(jnp.max(jnp.abs(o2 - ref2)))
        assert e2 < 5e-2, f"H=128 split={split} err={e2}"

    print("KERNEL_OK")
</pallas_src>

<mosaic_0001>
module attributes {stable_mosaic.version = 11 : i64} {
  func.func @_bigru_interleaved_kernel(%arg0: i32, %arg1: memref<1x8x8x48xf32, #tpu.memory_space<vmem>>, %arg2: memref<1x8x8x48xf32, #tpu.memory_space<vmem>>, %arg3: memref<2x16x48xbf16, #tpu.memory_space<vmem>>, %arg4: memref<2x1x16xf32, #tpu.memory_space<vmem>>, %arg5: memref<8x8x16xf32, #tpu.memory_space<vmem>>, %arg6: memref<8x8x16xf32, #tpu.memory_space<vmem>>, %arg7: memref<8x16xf32, #tpu.memory_space<vmem>>, %arg8: memref<8x16xf32, #tpu.memory_space<vmem>>) attributes {dimension_semantics = [#tpu.dimension_semantics<arbitrary>], iteration_bounds = array<i64: 1>, scalar_prefetch = 0 : i64, scratch_operands = 2 : i64, tpu.core_type = #tpu.core_type<tc>, window_params = [{transform_indices = @transform_0, window_bounds = array<i64: 1, 8, 8, 48>}, {transform_indices = @transform_1, window_bounds = array<i64: 1, 8, 8, 48>}, {pipeline_mode = #tpu.pipeline_mode<synchronous>, transform_indices = @transform_2, window_bounds = array<i64: 2, 16, 48>}, {pipeline_mode = #tpu.pipeline_mode<synchronous>, transform_indices = @transform_3, window_bounds = array<i64: 2, 1, 16>}, {transform_indices = @transform_4, window_bounds = array<i64: 8, 8, 16>}, {transform_indices = @transform_5, window_bounds = array<i64: 8, 8, 16>}]} {
    %c0_i32 = arith.constant 0 : i32
    %0 = arith.cmpi eq, %arg0, %c0_i32 : i32
    %1 = arith.extui %0 : i1 to i32
    %c0_i32_0 = arith.constant 0 : i32
    %2 = arith.cmpi ne, %1, %c0_i32_0 : i32
    scf.if %2 {
      %cst_181 = arith.constant 0.000000e+00 : f32
      %503 = vector.broadcast %cst_181 : f32 to vector<8x16xf32>
      %c0_182 = arith.constant 0 : index
      %c0_183 = arith.constant 0 : index
      %504 = vector.load %arg7[%c0_182, %c0_183] : memref<8x16xf32, #tpu.memory_space<vmem>>, vector<8x16xf32>
      tpu.vector_store %arg7[%c0_182, %c0_183], %503 {strides = array<i32>} : memref<8x16xf32, #tpu.memory_space<vmem>>, vector<8x16xf32>,
      %cst_184 = arith.constant 0.000000e+00 : f32
      %505 = vector.broadcast %cst_184 : f32 to vector<8x16xf32>
      %c0_185 = arith.constant 0 : index
      %c0_186 = arith.constant 0 : index
      %506 = vector.load %arg8[%c0_185, %c0_186] : memref<8x16xf32, #tpu.memory_space<vmem>>, vector<8x16xf32>
      tpu.vector_store %arg8[%c0_185, %c0_186], %505 {strides = array<i32>} : memref<8x16xf32, #tpu.memory_space<vmem>>, vector<8x16xf32>,
    } else {
    }
    %c0 = arith.constant 0 : index
    %c0_1 = arith.constant 0 : index
    %c0_2 = arith.constant 0 : index
    %3 = vector.load %arg4[%c0, %c0_1, %c0_2] : memref<2x1x16xf32, #tpu.memory_space<vmem>>, vector<1x1x16xf32>
    %4 = vector.shape_cast %3 : vector<1x1x16xf32> to vector<1x16xf32>
    %5 = vector.shape_cast %4 : vector<1x16xf32> to vector<1x16xf32>
    %6 = vector.broadcast %5 : vector<1x16xf32> to vector<8x16xf32>
    %c1 = arith.constant 1 : index
    %c0_3 = arith.constant 0 : index
    %c0_4 = arith.constant 0 : index
    %7 = vector.load %arg4[%c1, %c0_3, %c0_4] : memref<2x1x16xf32, #tpu.memory_space<vmem>>, vector<1x1x16xf32>
    %8 = vector.shape_cast %7 : vector<1x1x16xf32> to vector<1x16xf32>
    %9 = vector.shape_cast %8 : vector<1x16xf32> to vector<1x16xf32>
    %10 = vector.broadcast %9 : vector<1x16xf32> to vector<8x16xf32>
    %c0_5 = arith.constant 0 : index
    %c0_6 = arith.constant 0 : index
    %11 = vector.load %arg7[%c0_5, %c0_6] : memref<8x16xf32, #tpu.memory_space<vmem>>, vector<8x16xf32>
    %c0_7 = arith.constant 0 : index
    %c0_8 = arith.constant 0 : index
    %12 = vector.load %arg8[%c0_7, %c0_8] : memref<8x16xf32, #tpu.memory_space<vmem>>, vector<8x16xf32>
    %c0_i32_9 = arith.constant 0 : i32
    %c7_i32 = arith.constant 7 : i32
    %13 = arith.subi %c7_i32, %c0_i32_9 : i32
    %c0_10 = arith.constant 0 : index
    %14 = arith.index_cast %c0_i32_9 : i32 to index
    %c0_11 = arith.constant 0 : index
    %c0_12 = arith.constant 0 : index
    %15 = vector.load %arg1[%c0_10, %14, %c0_11, %c0_12] : memref<1x8x8x48xf32, #tpu.memory_space<vmem>>, vector<1x1x8x48xf32>
    %16 = vector.shape_cast %15 : vector<1x1x8x48xf32> to vector<8x48xf32>
    %c0_13 = arith.constant 0 : index
    %c0_14 = arith.constant 0 : index
    %c0_15 = arith.constant 0 : index
    %17 = vector.load %arg3[%c0_13, %c0_14, %c0_15] : memref<2x16x48xbf16, #tpu.memory_space<vmem>>, vector<1x16x48xbf16>
    %18 = vector.shape_cast %17 : vector<1x16x48xbf16> to vector<16x48xbf16>
    %19 = arith.truncf %11 : vector<8x16xf32> to vector<8x16xbf16>
    %cst = arith.constant dense<0.000000e+00> : vector<8x48xf32>
    %20 = tpu.matmul %19, %18, %cst {dimension_numbers = #tpu.dot_dimension_numbers<[1], [0], [0], [1], [0, 0, 1, 1], [], []>} : vector<8x16xbf16>, vector<16x48xbf16>, vector<8x48xf32> -> vector<8x48xf32>
    %21 = vector.extract_strided_slice %16 {offsets = [0, 0], sizes = [8, 32], strides = [1, 1]} : vector<8x48xf32> to vector<8x32xf32>
    %22 = vector.extract_strided_slice %20 {offsets = [0, 0], sizes = [8, 32], strides = [1, 1]} : vector<8x48xf32> to vector<8x32xf32>
    %23 = arith.addf %21, %22 : vector<8x32xf32>
    %24 = arith.negf %23 : vector<8x32xf32>
    %25 = math.exp %24 : vector<8x32xf32>
    %cst_16 = arith.constant 1.000000e+00 : f32
    %26 = vector.broadcast %cst_16 : f32 to vector<8x32xf32>
    %27 = arith.addf %26, %25 : vector<8x32xf32>
    %28 = arith.divf %26, %27 : vector<8x32xf32>
    %29 = vector.extract_strided_slice %28 {offsets = [0, 0], sizes = [8, 16], strides = [1, 1]} : vector<8x32xf32> to vector<8x16xf32>
    %30 = vector.extract_strided_slice %28 {offsets = [0, 16], sizes = [8, 16], strides = [1, 1]} : vector<8x32xf32> to vector<8x16xf32>
    %31 = vector.extract_strided_slice %16 {offsets = [0, 32], sizes = [8, 16], strides = [1, 1]} : vector<8x48xf32> to vector<8x16xf32>
    %32 = vector.extract_strided_slice %20 {offsets = [0, 32], sizes = [8, 16], strides = [1, 1]} : vector<8x48xf32> to vector<8x16xf32>
    %33 = arith.addf %32, %6 : vector<8x16xf32>
    %34 = arith.mulf %29, %33 : vector<8x16xf32>
    %35 = arith.addf %31, %34 : vector<8x16xf32>
    %36 = math.tanh %35 : vector<8x16xf32>
    %37 = arith.subf %11, %36 : vector<8x16xf32>
    %38 = arith.mulf %30, %37 : vector<8x16xf32>
    %39 = arith.addf %36, %38 : vector<8x16xf32>
    %c0_17 = arith.constant 0 : index
    %40 = arith.index_cast %13 : i32 to index
    %c0_18 = arith.constant 0 : index
    %c0_19 = arith.constant 0 : index
    %41 = vector.load %arg2[%c0_17, %40, %c0_18, %c0_19] : memref<1x8x8x48xf32, #tpu.memory_space<vmem>>, vector<1x1x8x48xf32>
    %42 = vector.shape_cast %41 : vector<1x1x8x48xf32> to vector<8x48xf32>
    %c1_20 = arith.constant 1 : index
    %c0_21 = arith.constant 0 : index
    %c0_22 = arith.constant 0 : index
    %43 = vector.load %arg3[%c1_20, %c0_21, %c0_22] : memref<2x16x48xbf16, #tpu.memory_space<vmem>>, vector<1x16x48xbf16>
    %44 = vector.shape_cast %43 : vector<1x16x48xbf16> to vector<16x48xbf16>
    %45 = arith.truncf %12 : vector<8x16xf32> to vector<8x16xbf16>
    %cst_23 = arith.constant dense<0.000000e+00> : vector<8x48xf32>
    %46 = tpu.matmul %45, %44, %cst_23 {dimension_numbers = #tpu.dot_dimension_numbers<[1], [0], [0], [1], [0, 0, 1, 1], [], []>} : vector<8x16xbf16>, vector<16x48xbf16>, vector<8x48xf32> -> vector<8x48xf32>
    %47 = vector.extract_strided_slice %42 {offsets = [0, 0], sizes = [8, 32], strides = [1, 1]} : vector<8x48xf32> to vector<8x32xf32>
    %48 = vector.extract_strided_slice %46 {offsets = [0, 0], sizes = [8, 32], strides = [1, 1]} : vector<8x48xf32> to vector<8x32xf32>
    %49 = arith.addf %47, %48 : vector<8x32xf32>
    %50 = arith.negf %49 : vector<8x32xf32>
    %51 = math.exp %50 : vector<8x32xf32>
    %cst_24 = arith.constant 1.000000e+00 : f32
    %52 = vector.broadcast %cst_24 : f32 to vector<8x32xf32>
    %53 = arith.addf %52, %51 : vector<8x32xf32>
    %54 = arith.divf %52, %53 : vector<8x32xf32>
    %55 = vector.extract_strided_slice %54 {offsets = [0, 0], sizes = [8, 16], strides = [1, 1]} : vector<8x32xf32> to vector<8x16xf32>
    %56 = vector.extract_strided_slice %54 {offsets = [0, 16], sizes = [8, 16], strides = [1, 1]} : vector<8x32xf32> to vector<8x16xf32>
    %57 = vector.extract_strided_slice %42 {offsets = [0, 32], sizes = [8, 16], strides = [1, 1]} : vector<8x48xf32> to vector<8x16xf32>
    %58 = vector.extract_strided_slice %46 {offsets = [0, 32], sizes = [8, 16], strides = [1, 1]} : vector<8x48xf32> to vector<8x16xf32>
    %59 = arith.addf %58, %10 : vector<8x16xf32>
    %60 = arith.mulf %55, %59 : vector<8x16xf32>
    %61 = arith.addf %57, %60 : vector<8x16xf32>
    %62 = math.tanh %61 : vector<8x16xf32>
    %63 = arith.subf %12, %62 : vector<8x16xf32>
    %64 = arith.mulf %56, %63 : vector<8x16xf32>
    %65 = arith.addf %62, %64 : vector<8x16xf32>
    %66 = arith.index_cast %c0_i32_9 : i32 to index
    %c0_25 = arith.constant 0 : index
    %c0_26 = arith.constant 0 : index
    %67 = vector.load %arg5[%66, %c0_25, %c0_26] : memref<8x8x16xf32, #tpu.memory_space<vmem>>, vector<1x8x16xf32>
    %68 = vector.shape_cast %67 : vector<1x8x16xf32> to vector<8x16xf32>
    %69 = vector.shape_cast %39 : vector<8x16xf32> to vector<1x8x16xf32>
    tpu.vector_store %arg5[%66, %c0_25, %c0_26], %69 {strides = array<i32>} : memref<8x8x16xf32, #tpu.memory_space<vmem>>, vector<1x8x16xf32>,
    %70 = arith.index_cast %13 : i32 to index
    %c0_27 = arith.constant 0 : index
    %c0_28 = arith.constant 0 : index
    %71 = vector.load %arg6[%70, %c0_27, %c0_28] : memref<8x8x16xf32, #tpu.memory_space<vmem>>, vector<1x8x16xf32>
    %72 = vector.shape_cast %71 : vector<1x8x16xf32> to vector<8x16xf32>
    %73 = vector.shape_cast %65 : vector<8x16xf32> to vector<1x8x16xf32>
    tpu.vector_store %arg6[%70, %c0_27, %c0_28], %73 {strides = array<i32>} : memref<8x8x16xf32, #tpu.memory_space<vmem>>, vector<1x8x16xf32>,
    %c1_i32 = arith.constant 1 : i32
    %c7_i32_29 = arith.constant 7 : i32
    %74 = arith.subi %c7_i32_29, %c1_i32 : i32
    %c0_30 = arith.constant 0 : index
    %75 = arith.index_cast %c1_i32 : i32 to index
    %c0_31 = arith.constant 0 : index
    %c0_32 = arith.constant 0 : index
    %76 = vector.load %arg1[%c0_30, %75, %c0_31, %c0_32] : memref<1x8x8x48xf32, #tpu.memory_space<vmem>>, vector<1x1x8x48xf32>
    %77 = vector.shape_cast %76 : vector<1x1x8x48xf32> to vector<8x48xf32>
    %c0_33 = arith.constant 0 : index
    %c0_34 = arith.constant 0 : index
    %c0_35 = arith.constant 0 : index
    %78 = vector.load %arg3[%c0_33, %c0_34, %c0_35] : memref<2x16x48xbf16, #tpu.memory_space<vmem>>, vector<1x16x48xbf16>
    %79 = vector.shape_cast %78 : vector<1x16x48xbf16> to vector<16x48xbf16>
    %80 = arith.truncf %39 : vector<8x16xf32> to vector<8x16xbf16>
    %cst_36 = arith.constant dense<0.000000e+00> : vector<8x48xf32>
    %81 = tpu.matmul %80, %79, %cst_36 {dimension_numbers = #tpu.dot_dimension_numbers<[1], [0], [0], [1], [0, 0, 1, 1], [], []>} : vector<8x16xbf16>, vector<16x48xbf16>, vector<8x48xf32> -> vector<8x48xf32>
    %82 = vector.extract_strided_slice %77 {offsets = [0, 0], sizes = [8, 32], strides = [1, 1]} : vector<8x48xf32> to vector<8x32xf32>
    %83 = vector.extract_strided_slice %81 {offsets = [0, 0], sizes = [8, 32], strides = [1, 1]} : vector<8x48xf32> to vector<8x32xf32>
    %84 = arith.addf %82, %83 : vector<8x32xf32>
    %85 = arith.negf %84 : vector<8x32xf32>
    %86 = math.exp %85 : vector<8x32xf32>
    %cst_37 = arith.constant 1.000000e+00 : f32
    %87 = vector.broadcast %cst_37 : f32 to vector<8x32xf32>
    %88 = arith.addf %87, %86 : vector<8x32xf32>
    %89 = arith.divf %87, %88 : vector<8x32xf32>
    %90 = vector.extract_strided_slice %89 {offsets = [0, 0], sizes = [8, 16], strides = [1, 1]} : vector<8x32xf32> to vector<8x16xf32>
    %91 = vector.extract_strided_slice %89 {offsets = [0, 16], sizes = [8, 16], strides = [1, 1]} : vector<8x32xf32> to vector<8x16xf32>
    %92 = vector.extract_strided_slice %77 {offsets = [0, 32], sizes = [8, 16], strides = [1, 1]} : vector<8x48xf32> to vector<8x16xf32>
    %93 = vector.extract_strided_slice %81 {offsets = [0, 32], sizes = [8, 16], strides = [1, 1]} : vector<8x48xf32> to vector<8x16xf32>
    %94 = arith.addf %93, %6 : vector<8x16xf32>
    %95 = arith.mulf %90, %94 : vector<8x16xf32>
    %96 = arith.addf %92, %95 : vector<8x16xf32>
    %97 = math.tanh %96 : vector<8x16xf32>
    %98 = arith.subf %39, %97 : vector<8x16xf32>
    %99 = arith.mulf %91, %98 : vector<8x16xf32>
    %100 = arith.addf %97, %99 : vector<8x16xf32>
    %c0_38 = arith.constant 0 : index
    %101 = arith.index_cast %74 : i32 to index
    %c0_39 = arith.constant 0 : index
    %c0_40 = arith.constant 0 : index
    %102 = vector.load %arg2[%c0_38, %101, %c0_39, %c0_40] : memref<1x8x8x48xf32, #tpu.memory_space<vmem>>, vector<1x1x8x48xf32>
    %103 = vector.shape_cast %102 : vector<1x1x8x48xf32> to vector<8x48xf32>
    %c1_41 = arith.constant 1 : index
    %c0_42 = arith.constant 0 : index
    %c0_43 = arith.constant 0 : index
    %104 = vector.load %arg3[%c1_41, %c0_42, %c0_43] : memref<2x16x48xbf16, #tpu.memory_space<vmem>>, vector<1x16x48xbf16>
    %105 = vector.shape_cast %104 : vector<1x16x48xbf16> to vector<16x48xbf16>
    %106 = arith.truncf %65 : vector<8x16xf32> to vector<8x16xbf16>
    %cst_44 = arith.constant dense<0.000000e+00> : vector<8x48xf32>
    %107 = tpu.matmul %106, %105, %cst_44 {dimension_numbers = #tpu.dot_dimension_numbers<[1], [0], [0], [1], [0, 0, 1, 1], [], []>} : vector<8x16xbf16>, vector<16x48xbf16>, vector<8x48xf32> -> vector<8x48xf32>
    %108 = vector.extract_strided_slice %103 {offsets = [0, 0], sizes = [8, 32], strides = [1, 1]} : vector<8x48xf32> to vector<8x32xf32>
    %109 = vector.extract_strided_slice %107 {offsets = [0, 0], sizes = [8, 32], strides = [1, 1]} : vector<8x48xf32> to vector<8x32xf32>
    %110 = arith.addf %108, %109 : vector<8x32xf32>
    %111 = arith.negf %110 : vector<8x32xf32>
    %112 = math.exp %111 : vector<8x32xf32>
    %cst_45 = arith.constant 1.000000e+00 : f32
    %113 = vector.broadcast %cst_45 : f32 to vector<8x32xf32>
    %114 = arith.addf %113, %112 : vector<8x32xf32>
    %115 = arith.divf %113, %114 : vector<8x32xf32>
    %116 = vector.extract_strided_slice %115 {offsets = [0, 0], sizes = [8, 16], strides = [1, 1]} : vector<8x32xf32> to vector<8x16xf32>
    %117 = vector.extract_strided_slice %115 {offsets = [0, 16], sizes = [8, 16], strides = [1, 1]} : vector<8x32xf32> to vector<8x16xf32>
    %118 = vector.extract_strided_slice %103 {offsets = [0, 32], sizes = [8, 16], strides = [1, 1]} : vector<8x48xf32> to vector<8x16xf32>
    %119 = vector.extract_strided_slice %107 {offsets = [0, 32], sizes = [8, 16], strides = [1, 1]} : vector<8x48xf32> to vector<8x16xf32>
    %120 = arith.addf %119, %10 : vector<8x16xf32>
    %121 = arith.mulf %116, %120 : vector<8x16xf32>
    %122 = arith.addf %118, %121 : vector<8x16xf32>
    %123 = math.tanh %122 : vector<8x16xf32>
    %124 = arith.subf %65, %123 : vector<8x16xf32>
    %125 = arith.mulf %117, %124 : vector<8x16xf32>
    %126 = arith.addf %123, %125 : vector<8x16xf32>
    %127 = arith.index_cast %c1_i32 : i32 to index
    %c0_46 = arith.constant 0 : index
    %c0_47 = arith.constant 0 : index
    %128 = vector.load %arg5[%127, %c0_46, %c0_47] : memref<8x8x16xf32, #tpu.memory_space<vmem>>, vector<1x8x16xf32>
    %129 = vector.shape_cast %128 : vector<1x8x16xf32> to vector<8x16xf32>
    %130 = vector.shape_cast %100 : vector<8x16xf32> to vector<1x8x16xf32>
    tpu.vector_store %arg5[%127, %c0_46, %c0_47], %130 {strides = array<i32>} : memref<8x8x16xf32, #tpu.memory_space<vmem>>, vector<1x8x16xf32>,
    %131 = arith.index_cast %74 : i32 to index
    %c0_48 = arith.constant 0 : index
    %c0_49 = arith.constant 0 : index
    %132 = vector.load %arg6[%131, %c0_48, %c0_49] : memref<8x8x16xf32, #tpu.memory_space<vmem>>, vector<1x8x16xf32>
    %133 = vector.shape_cast %132 : vector<1x8x16xf32> to vector<8x16xf32>
    %134 = vector.shape_cast %126 : vector<8x16xf32> to vector<1x8x16xf32>
    tpu.vector_store %arg6[%131, %c0_48, %c0_49], %134 {strides = array<i32>} : memref<8x8x16xf32, #tpu.memory_space<vmem>>, vector<1x8x16xf32>,
    %c2_i32 = arith.constant 2 : i32
    %c7_i32_50 = arith.constant 7 : i32
    %135 = arith.subi %c7_i32_50, %c2_i32 : i32
    %c0_51 = arith.constant 0 : index
    %136 = arith.index_cast %c2_i32 : i32 to index
    %c0_52 = arith.constant 0 : index
    %c0_53 = arith.constant 0 : index
    %137 = vector.load %arg1[%c0_51, %136, %c0_52, %c0_53] : memref<1x8x8x48xf32, #tpu.memory_space<vmem>>, vector<1x1x8x48xf32>
    %138 = vector.shape_cast %137 : vector<1x1x8x48xf32> to vector<8x48xf32>
    %c0_54 = arith.constant 0 : index
    %c0_55 = arith.constant 0 : index
    %c0_56 = arith.constant 0 : index
    %139 = vector.load %arg3[%c0_54, %c0_55, %c0_56] : memref<2x16x48xbf16, #tpu.memory_space<vmem>>, vector<1x16x48xbf16>
    %140 = vector.shape_cast %139 : vector<1x16x48xbf16> to vector<16x48xbf16>
    %141 = arith.truncf %100 : vector<8x16xf32> to vector<8x16xbf16>
    %cst_57 = arith.constant dense<0.000000e+00> : vector<8x48xf32>
    %142 = tpu.matmul %141, %140, %cst_57 {dimension_numbers = #tpu.dot_dimension_numbers<[1], [0], [0], [1], [0, 0, 1, 1], [], []>} : vector<8x16xbf16>, vector<16x48xbf16>, vector<8x48xf32> -> vector<8x48xf32>
    %143 = vector.extract_strided_slice %138 {offsets = [0, 0], sizes = [8, 32], strides = [1, 1]} : vector<8x48xf32> to vector<8x32xf32>
    %144 = vector.extract_strided_slice %142 {offsets = [0, 0], sizes = [8, 32], strides = [1, 1]} : vector<8x48xf32> to vector<8x32xf32>
    %145 = arith.addf %143, %144 : vector<8x32xf32>
    %146 = arith.negf %145 : vector<8x32xf32>
    %147 = math.exp %146 : vector<8x32xf32>
    %cst_58 = arith.constant 1.000000e+00 : f32
    %148 = vector.broadcast %cst_58 : f32 to vector<8x32xf32>
    %149 = arith.addf %148, %147 : vector<8x32xf32>
    %150 = arith.divf %148, %149 : vector<8x32xf32>
    %151 = vector.extract_strided_slice %150 {offsets = [0, 0], sizes = [8, 16], strides = [1, 1]} : vector<8x32xf32> to vector<8x16xf32>
    %152 = vector.extract_strided_slice %150 {offsets = [0, 16], sizes = [8, 16], strides = [1, 1]} : vector<8x32xf32> to vector<8x16xf32>
    %153 = vector.extract_strided_slice %138 {offsets = [0, 32], sizes = [8, 16], strides = [1, 1]} : vector<8x48xf32> to vector<8x16xf32>
    %154 = vector.extract_strided_slice %142 {offsets = [0, 32], sizes = [8, 16], strides = [1, 1]} : vector<8x48xf32> to vector<8x16xf32>
    %155 = arith.addf %154, %6 : vector<8x16xf32>
    %156 = arith.mulf %151, %155 : vector<8x16xf32>
    %157 = arith.addf %153, %156 : vector<8x16xf32>
    %158 = math.tanh %157 : vector<8x16xf32>
    %159 = arith.subf %100, %158 : vector<8x16xf32>
    %160 = arith.mulf %152, %159 : vector<8x16xf32>
    %161 = arith.addf %158, %160 : vector<8x16xf32>
    %c0_59 = arith.constant 0 : index
    %162 = arith.index_cast %135 : i32 to index
    %c0_60 = arith.constant 0 : index
    %c0_61 = arith.constant 0 : index
    %163 = vector.load %arg2[%c0_59, %162, %c0_60, %c0_61] : memref<1x8x8x48xf32, #tpu.memory_space<vmem>>, vector<1x1x8x48xf32>
    %164 = vector.shape_cast %163 : vector<1x1x8x48xf32> to vector<8x48xf32>
    %c1_62 = arith.constant 1 : index
    %c0_63 = arith.constant 0 : index
    %c0_64 = arith.constant 0 : index
    %165 = vector.load %arg3[%c1_62, %c0_63, %c0_64] : memref<2x16x48xbf16, #tpu.memory_space<vmem>>, vector<1x16x48xbf16>
    %166 = vector.shape_cast %165 : vector<1x16x48xbf16> to vector<16x48xbf16>
    %167 = arith.truncf %126 : vector<8x16xf32> to vector<8x16xbf16>
    %cst_65 = arith.constant dense<0.000000e+00> : vector<8x48xf32>
    %168 = tpu.matmul %167, %166, %cst_65 {dimension_numbers = #tpu.dot_dimension_numbers<[1], [0], [0], [1], [0, 0, 1, 1], [], []>} : vector<8x16xbf16>, vector<16x48xbf16>, vector<8x48xf32> -> vector<8x48xf32>
    %169 = vector.extract_strided_slice %164 {offsets = [0, 0], sizes = [8, 32], strides = [1, 1]} : vector<8x48xf32> to vector<8x32xf32>
    %170 = vector.extract_strided_slice %168 {offsets = [0, 0], sizes = [8, 32], strides = [1, 1]} : vector<8x48xf32> to vector<8x32xf32>
    %171 = arith.addf %169, %170 : vector<8x32xf32>
    %172 = arith.negf %171 : vector<8x32xf32>
    %173 = math.exp %172 : vector<8x32xf32>
    %cst_66 = arith.constant 1.000000e+00 : f32
    %174 = vector.broadcast %cst_66 : f32 to vector<8x32xf32>
    %175 = arith.addf %174, %173 : vector<8x32xf32>
    %176 = arith.divf %174, %175 : vector<8x32xf32>
    %177 = vector.extract_strided_slice %176 {offsets = [0, 0], sizes = [8, 16], strides = [1, 1]} : vector<8x32xf32> to vector<8x16xf32>
    %178 = vector.extract_strided_slice %176 {offsets = [0, 16], sizes = [8, 16], strides = [1, 1]} : vector<8x32xf32> to vector<8x16xf32>
    %179 = vector.extract_strided_slice %164 {offsets = [0, 32], sizes = [8, 16], strides = [1, 1]} : vector<8x48xf32> to vector<8x16xf32>
    %180 = vector.extract_strided_slice %168 {offsets = [0, 32], sizes = [8, 16], strides = [1, 1]} : vector<8x48xf32> to vector<8x16xf32>
    %181 = arith.addf %180, %10 : vector<8x16xf32>
    %182 = arith.mulf %177, %181 : vector<8x16xf32>
    %183 = arith.addf %179, %182 : vector<8x16xf32>
    %184 = math.tanh %183 : vector<8x16xf32>
    %185 = arith.subf %126, %184 : vector<8x16xf32>
    %186 = arith.mulf %178, %185 : vector<8x16xf32>
    %187 = arith.addf %184, %186 : vector<8x16xf32>
    %188 = arith.index_cast %c2_i32 : i32 to index
    %c0_67 = arith.constant 0 : index
    %c0_68 = arith.constant 0 : index
    %189 = vector.load %arg5[%188, %c0_67, %c0_68] : memref<8x8x16xf32, #tpu.memory_space<vmem>>, vector<1x8x16xf32>
    %190 = vector.shape_cast %189 : vector<1x8x16xf32> to vector<8x16xf32>
    %191 = vector.shape_cast %161 : vector<8x16xf32> to vector<1x8x16xf32>
    tpu.vector_store %arg5[%188, %c0_67, %c0_68], %191 {strides = array<i32>} : memref<8x8x16xf32, #tpu.memory_space<vmem>>, vector<1x8x16xf32>,
    %192 = arith.index_cast %135 : i32 to index
    %c0_69 = arith.constant 0 : index
    %c0_70 = arith.constant 0 : index
    %193 = vector.load %arg6[%192, %c0_69, %c0_70] : memref<8x8x16xf32, #tpu.memory_space<vmem>>, vector<1x8x16xf32>
    %194 = vector.shape_cast %193 : vector<1x8x16xf32> to vector<8x16xf32>
    %195 = vector.shape_cast %187 : vector<8x16xf32> to vector<1x8x16xf32>
    tpu.vector_store %arg6[%192, %c0_69, %c0_70], %195 {strides = array<i32>} : memref<8x8x16xf32, #tpu.memory_space<vmem>>, vector<1x8x16xf32>,
    %c3_i32 = arith.constant 3 : i32
    %c7_i32_71 = arith.constant 7 : i32
    %196 = arith.subi %c7_i32_71, %c3_i32 : i32
    %c0_72 = arith.constant 0 : index
    %197 = arith.index_cast %c3_i32 : i32 to index
    %c0_73 = arith.constant 0 : index
    %c0_74 = arith.constant 0 : index
    %198 = vector.load %arg1[%c0_72, %197, %c0_73, %c0_74] : memref<1x8x8x48xf32, #tpu.memory_space<vmem>>, vector<1x1x8x48xf32>
    %199 = vector.shape_cast %198 : vector<1x1x8x48xf32> to vector<8x48xf32>
    %c0_75 = arith.constant 0 : index
    %c0_76 = arith.constant 0 : index
    %c0_77 = arith.constant 0 : index
    %200 = vector.load %arg3[%c0_75, %c0_76, %c0_77] : memref<2x16x48xbf16, #tpu.memory_space<vmem>>, vector<1x16x48xbf16>
    %201 = vector.shape_cast %200 : vector<1x16x48xbf16> to vector<16x48xbf16>
    %202 = arith.truncf %161 : vector<8x16xf32> to vector<8x16xbf16>
    %cst_78 = arith.constant dense<0.000000e+00> : vector<8x48xf32>
    %203 = tpu.matmul %202, %201, %cst_78 {dimension_numbers = #tpu.dot_dimension_numbers<[1], [0], [0], [1], [0, 0, 1, 1], [], []>} : vector<8x16xbf16>, vector<16x48xbf16>, vector<8x48xf32> -> vector<8x48xf32>
    %204 = vector.extract_strided_slice %199 {offsets = [0, 0], sizes = [8, 32], strides = [1, 1]} : vector<8x48xf32> to vector<8x32xf32>
    %205 = vector.extract_strided_slice %203 {offsets = [0, 0], sizes = [8, 32], strides = [1, 1]} : vector<8x48xf32> to vector<8x32xf32>
    %206 = arith.addf %204, %205 : vector<8x32xf32>
    %207 = arith.negf %206 : vector<8x32xf32>
    %208 = math.exp %207 : vector<8x32xf32>
    %cst_79 = arith.constant 1.000000e+00 : f32
    %209 = vector.broadcast %cst_79 : f32 to vector<8x32xf32>
    %210 = arith.addf %209, %208 : vector<8x32xf32>
    %211 = arith.divf %209, %210 : vector<8x32xf32>
    %212 = vector.extract_strided_slice %211 {offsets = [0, 0], sizes = [8, 16], strides = [1, 1]} : vector<8x32xf32> to vector<8x16xf32>
    %213 = vector.extract_strided_slice %211 {offsets = [0, 16], sizes = [8, 16], strides = [1, 1]} : vector<8x32xf32> to vector<8x16xf32>
    %214 = vector.extract_strided_slice %199 {offsets = [0, 32], sizes = [8, 16], strides = [1, 1]} : vector<8x48xf32> to vector<8x16xf32>
    %215 = vector.extract_strided_slice %203 {offsets = [0, 32], sizes = [8, 16], strides = [1, 1]} : vector<8x48xf32> to vector<8x16xf32>
    %216 = arith.addf %215, %6 : vector<8x16xf32>
    %217 = arith.mulf %212, %216 : vector<8x16xf32>
    %218 = arith.addf %214, %217 : vector<8x16xf32>
    %219 = math.tanh %218 : vector<8x16xf32>
    %220 = arith.subf %161, %219 : vector<8x16xf32>
    %221 = arith.mulf %213, %220 : vector<8x16xf32>
    %222 = arith.addf %219, %221 : vector<8x16xf32>
    %c0_80 = arith.constant 0 : index
    %223 = arith.index_cast %196 : i32 to index
    %c0_81 = arith.constant 0 : index
    %c0_82 = arith.constant 0 : index
    %224 = vector.load %arg2[%c0_80, %223, %c0_81, %c0_82] : memref<1x8x8x48xf32, #tpu.memory_space<vmem>>, vector<1x1x8x48xf32>
    %225 = vector.shape_cast %224 : vector<1x1x8x48xf32> to vector<8x48xf32>
    %c1_83 = arith.constant 1 : index
    %c0_84 = arith.constant 0 : index
    %c0_85 = arith.constant 0 : index
    %226 = vector.load %arg3[%c1_83, %c0_84, %c0_85] : memref<2x16x48xbf16, #tpu.memory_space<vmem>>, vector<1x16x48xbf16>
    %227 = vector.shape_cast %226 : vector<1x16x48xbf16> to vector<16x48xbf16>
    %228 = arith.truncf %187 : vector<8x16xf32> to vector<8x16xbf16>
    %cst_86 = arith.constant dense<0.000000e+00> : vector<8x48xf32>
    %229 = tpu.matmul %228, %227, %cst_86 {dimension_numbers = #tpu.dot_dimension_numbers<[1], [0], [0], [1], [0, 0, 1, 1], [], []>} : vector<8x16xbf16>, vector<16x48xbf16>, vector<8x48xf32> -> vector<8x48xf32>
    %230 = vector.extract_strided_slice %225 {offsets = [0, 0], sizes = [8, 32], strides = [1, 1]} : vector<8x48xf32> to vector<8x32xf32>
    %231 = vector.extract_strided_slice %229 {offsets = [0, 0], sizes = [8, 32], strides = [1, 1]} : vector<8x48xf32> to vector<8x32xf32>
    %232 = arith.addf %230, %231 : vector<8x32xf32>
    %233 = arith.negf %232 : vector<8x32xf32>
    %234 = math.exp %233 : vector<8x32xf32>
    %cst_87 = arith.constant 1.000000e+00 : f32
    %235 = vector.broadcast %cst_87 : f32 to vector<8x32xf32>
    %236 = arith.addf %235, %234 : vector<8x32xf32>
    %237 = arith.divf %235, %236 : vector<8x32xf32>
    %238 = vector.extract_strided_slice %237 {offsets = [0, 0], sizes = [8, 16], strides = [1, 1]} : vector<8x32xf32> to vector<8x16xf32>
    %239 = vector.extract_strided_slice %237 {offsets = [0, 16], sizes = [8, 16], strides = [1, 1]} : vector<8x32xf32> to vector<8x16xf32>
    %240 = vector.extract_strided_slice %225 {offsets = [0, 32], sizes = [8, 16], strides = [1, 1]} : vector<8x48xf32> to vector<8x16xf32>
    %241 = vector.extract_strided_slice %229 {offsets = [0, 32], sizes = [8, 16], strides = [1, 1]} : vector<8x48xf32> to vector<8x16xf32>
    %242 = arith.addf %241, %10 : vector<8x16xf32>
    %243 = arith.mulf %238, %242 : vector<8x16xf32>
    %244 = arith.addf %240, %243 : vector<8x16xf32>
    %245 = math.tanh %244 : vector<8x16xf32>
    %246 = arith.subf %187, %245 : vector<8x16xf32>
    %247 = arith.mulf %239, %246 : vector<8x16xf32>
    %248 = arith.addf %245, %247 : vector<8x16xf32>
    %249 = arith.index_cast %c3_i32 : i32 to index
    %c0_88 = arith.constant 0 : index
    %c0_89 = arith.constant 0 : index
    %250 = vector.load %arg5[%249, %c0_88, %c0_89] : memref<8x8x16xf32, #tpu.memory_space<vmem>>, vector<1x8x16xf32>
    %251 = vector.shape_cast %250 : vector<1x8x16xf32> to vector<8x16xf32>
    %252 = vector.shape_cast %222 : vector<8x16xf32> to vector<1x8x16xf32>
    tpu.vector_store %arg5[%249, %c0_88, %c0_89], %252 {strides = array<i32>} : memref<8x8x16xf32, #tpu.memory_space<vmem>>, vector<1x8x16xf32>,
    %253 = arith.index_cast %196 : i32 to index
    %c0_90 = arith.constant 0 : index
    %c0_91 = arith.constant 0 : index
    %254 = vector.load %arg6[%253, %c0_90, %c0_91] : memref<8x8x16xf32, #tpu.memory_space<vmem>>, vector<1x8x16xf32>
    %255 = vector.shape_cast %254 : vector<1x8x16xf32> to vector<8x16xf32>
    %256 = vector.shape_cast %248 : vector<8x16xf32> to vector<1x8x16xf32>
    tpu.vector_store %arg6[%253, %c0_90, %c0_91], %256 {strides = array<i32>} : memref<8x8x16xf32, #tpu.memory_space<vmem>>, vector<1x8x16xf32>,
    %c4_i32 = arith.constant 4 : i32
    %c7_i32_92 = arith.constant 7 : i32
    %257 = arith.subi %c7_i32_92, %c4_i32 : i32
    %c0_93 = arith.constant 0 : index
    %258 = arith.index_cast %c4_i32 : i32 to index
    %c0_94 = arith.constant 0 : index
    %c0_95 = arith.constant 0 : index
    %259 = vector.load %arg1[%c0_93, %258, %c0_94, %c0_95] : memref<1x8x8x48xf32, #tpu.memory_space<vmem>>, vector<1x1x8x48xf32>
    %260 = vector.shape_cast %259 : vector<1x1x8x48xf32> to vector<8x48xf32>
    %c0_96 = arith.constant 0 : index
    %c0_97 = arith.constant 0 : index
    %c0_98 = arith.constant 0 : index
    %261 = vector.load %arg3[%c0_96, %c0_97, %c0_98] : memref<2x16x48xbf16, #tpu.memory_space<vmem>>, vector<1x16x48xbf16>
    %262 = vector.shape_cast %261 : vector<1x16x48xbf16> to vector<16x48xbf16>
    %263 = arith.truncf %222 : vector<8x16xf32> to vector<8x16xbf16>
    %cst_99 = arith.constant dense<0.000000e+00> : vector<8x48xf32>
    %264 = tpu.matmul %263, %262, %cst_99 {dimension_numbers = #tpu.dot_dimension_numbers<[1], [0], [0], [1], [0, 0, 1, 1], [], []>} : vector<8x16xbf16>, vector<16x48xbf16>, vector<8x48xf32> -> vector<8x48xf32>
    %265 = vector.extract_strided_slice %260 {offsets = [0, 0], sizes = [8, 32], strides = [1, 1]} : vector<8x48xf32> to vector<8x32xf32>
    %266 = vector.extract_strided_slice %264 {offsets = [0, 0], sizes = [8, 32], strides = [1, 1]} : vector<8x48xf32> to vector<8x32xf32>
    %267 = arith.addf %265, %266 : vector<8x32xf32>
    %268 = arith.negf %267 : vector<8x32xf32>
    %269 = math.exp %268 : vector<8x32xf32>
    %cst_100 = arith.constant 1.000000e+00 : f32
    %270 = vector.broadcast %cst_100 : f32 to vector<8x32xf32>
    %271 = arith.addf %270, %269 : vector<8x32xf32>
    %272 = arith.divf %270, %271 : vector<8x32xf32>
    %273 = vector.extract_strided_slice %272 {offsets = [0, 0], sizes = [8, 16], strides = [1, 1]} : vector<8x32xf32> to vector<8x16xf32>
    %274 = vector.extract_strided_slice %272 {offsets = [0, 16], sizes = [8, 16], strides = [1, 1]} : vector<8x32xf32> to vector<8x16xf32>
    %275 = vector.extract_strided_slice %260 {offsets = [0, 32], sizes = [8, 16], strides = [1, 1]} : vector<8x48xf32> to vector<8x16xf32>
    %276 = vector.extract_strided_slice %264 {offsets = [0, 32], sizes = [8, 16], strides = [1, 1]} : vector<8x48xf32> to vector<8x16xf32>
    %277 = arith.addf %276, %6 : vector<8x16xf32>
    %278 = arith.mulf %273, %277 : vector<8x16xf32>
    %279 = arith.addf %275, %278 : vector<8x16xf32>
    %280 = math.tanh %279 : vector<8x16xf32>
    %281 = arith.subf %222, %280 : vector<8x16xf32>
    %282 = arith.mulf %274, %281 : vector<8x16xf32>
    %283 = arith.addf %280, %282 : vector<8x16xf32>
    %c0_101 = arith.constant 0 : index
    %284 = arith.index_cast %257 : i32 to index
    %c0_102 = arith.constant 0 : index
    %c0_103 = arith.constant 0 : index
    %285 = vector.load %arg2[%c0_101, %284, %c0_102, %c0_103] : memref<1x8x8x48xf32, #tpu.memory_space<vmem>>, vector<1x1x8x48xf32>
    %286 = vector.shape_cast %285 : vector<1x1x8x48xf32> to vector<8x48xf32>
    %c1_104 = arith.constant 1 : index
    %c0_105 = arith.constant 0 : index
    %c0_106 = arith.constant 0 : index
    %287 = vector.load %arg3[%c1_104, %c0_105, %c0_106] : memref<2x16x48xbf16, #tpu.memory_space<vmem>>, vector<1x16x48xbf16>
    %288 = vector.shape_cast %287 : vector<1x16x48xbf16> to vector<16x48xbf16>
    %289 = arith.truncf %248 : vector<8x16xf32> to vector<8x16xbf16>
    %cst_107 = arith.constant dense<0.000000e+00> : vector<8x48xf32>
    %290 = tpu.matmul %289, %288, %cst_107 {dimension_numbers = #tpu.dot_dimension_numbers<[1], [0], [0], [1], [0, 0, 1, 1], [], []>} : vector<8x16xbf16>, vector<16x48xbf16>, vector<8x48xf32> -> vector<8x48xf32>
    %291 = vector.extract_strided_slice %286 {offsets = [0, 0], sizes = [8, 32], strides = [1, 1]} : vector<8x48xf32> to vector<8x32xf32>
    %292 = vector.extract_strided_slice %290 {offsets = [0, 0], sizes = [8, 32], strides = [1, 1]} : vector<8x48xf32> to vector<8x32xf32>
    %293 = arith.addf %291, %292 : vector<8x32xf32>
    %294 = arith.negf %293 : vector<8x32xf32>
    %295 = math.exp %294 : vector<8x32xf32>
    %cst_108 = arith.constant 1.000000e+00 : f32
    %296 = vector.broadcast %cst_108 : f32 to vector<8x32xf32>
    %297 = arith.addf %296, %295 : vector<8x32xf32>
    %298 = arith.divf %296, %297 : vector<8x32xf32>
    %299 = vector.extract_strided_slice %298 {offsets = [0, 0], sizes = [8, 16], strides = [1, 1]} : vector<8x32xf32> to vector<8x16xf32>
    %300 = vector.extract_strided_slice %298 {offsets = [0, 16], sizes = [8, 16], strides = [1, 1]} : vector<8x32xf32> to vector<8x16xf32>
    %301 = vector.extract_strided_slice %286 {offsets = [0, 32], sizes = [8, 16], strides = [1, 1]} : vector<8x48xf32> to vector<8x16xf32>
    %302 = vector.extract_strided_slice %290 {offsets = [0, 32], sizes = [8, 16], strides = [1, 1]} : vector<8x48xf32> to vector<8x16xf32>
    %303 = arith.addf %302, %10 : vector<8x16xf32>
    %304 = arith.mulf %299, %303 : vector<8x16xf32>
    %305 = arith.addf %301, %304 : vector<8x16xf32>
    %306 = math.tanh %305 : vector<8x16xf32>
    %307 = arith.subf %248, %306 : vector<8x16xf32>
    %308 = arith.mulf %300, %307 : vector<8x16xf32>
    %309 = arith.addf %306, %308 : vector<8x16xf32>
    %310 = arith.index_cast %c4_i32 : i32 to index
    %c0_109 = arith.constant 0 : index
    %c0_110 = arith.constant 0 : index
    %311 = vector.load %arg5[%310, %c0_109, %c0_110] : memref<8x8x16xf32, #tpu.memory_space<vmem>>, vector<1x8x16xf32>
    %312 = vector.shape_cast %311 : vector<1x8x16xf32> to vector<8x16xf32>
    %313 = vector.shape_cast %283 : vector<8x16xf32> to vector<1x8x16xf32>
    tpu.vector_store %arg5[%310, %c0_109, %c0_110], %313 {strides = array<i32>} : memref<8x8x16xf32, #tpu.memory_space<vmem>>, vector<1x8x16xf32>,
    %314 = arith.index_cast %257 : i32 to index
    %c0_111 = arith.constant 0 : index
    %c0_112 = arith.constant 0 : index
    %315 = vector.load %arg6[%314, %c0_111, %c0_112] : memref<8x8x16xf32, #tpu.memory_space<vmem>>, vector<1x8x16xf32>
    %316 = vector.shape_cast %315 : vector<1x8x16xf32> to vector<8x16xf32>
    %317 = vector.shape_cast %309 : vector<8x16xf32> to vector<1x8x16xf32>
    tpu.vector_store %arg6[%314, %c0_111, %c0_112], %317 {strides = array<i32>} : memref<8x8x16xf32, #tpu.memory_space<vmem>>, vector<1x8x16xf32>,
    %c5_i32 = arith.constant 5 : i32
    %c7_i32_113 = arith.constant 7 : i32
    %318 = arith.subi %c7_i32_113, %c5_i32 : i32
    %c0_114 = arith.constant 0 : index
    %319 = arith.index_cast %c5_i32 : i32 to index
    %c0_115 = arith.constant 0 : index
    %c0_116 = arith.constant 0 : index
    %320 = vector.load %arg1[%c0_114, %319, %c0_115, %c0_116] : memref<1x8x8x48xf32, #tpu.memory_space<vmem>>, vector<1x1x8x48xf32>
    %321 = vector.shape_cast %320 : vector<1x1x8x48xf32> to vector<8x48xf32>
    %c0_117 = arith.constant 0 : index
    %c0_118 = arith.constant 0 : index
    %c0_119 = arith.constant 0 : index
    %322 = vector.load %arg3[%c0_117, %c0_118, %c0_119] : memref<2x16x48xbf16, #tpu.memory_space<vmem>>, vector<1x16x48xbf16>
    %323 = vector.shape_cast %322 : vector<1x16x48xbf16> to vector<16x48xbf16>
    %324 = arith.truncf %283 : vector<8x16xf32> to vector<8x16xbf16>
    %cst_120 = arith.constant dense<0.000000e+00> : vector<8x48xf32>
    %325 = tpu.matmul %324, %323, %cst_120 {dimension_numbers = #tpu.dot_dimension_numbers<[1], [0], [0], [1], [0, 0, 1, 1], [], []>} : vector<8x16xbf16>, vector<16x48xbf16>, vector<8x48xf32> -> vector<8x48xf32>
    %326 = vector.extract_strided_slice %321 {offsets = [0, 0], sizes = [8, 32], strides = [1, 1]} : vector<8x48xf32> to vector<8x32xf32>
    %327 = vector.extract_strided_slice %325 {offsets = [0, 0], sizes = [8, 32], strides = [1, 1]} : vector<8x48xf32> to vector<8x32xf32>
    %328 = arith.addf %326, %327 : vector<8x32xf32>
    %329 = arith.negf %328 : vector<8x32xf32>
    %330 = math.exp %329 : vector<8x32xf32>
    %cst_121 = arith.constant 1.000000e+00 : f32
    %331 = vector.broadcast %cst_121 : f32 to vector<8x32xf32>
    %332 = arith.addf %331, %330 : vector<8x32xf32>
    %333 = arith.divf %331, %332 : vector<8x32xf32>
    %334 = vector.extract_strided_slice %333 {offsets = [0, 0], sizes = [8, 16], strides = [1, 1]} : vector<8x32xf32> to vector<8x16xf32>
    %335 = vector.extract_strided_slice %333 {offsets = [0, 16], sizes = [8, 16], strides = [1, 1]} : vector<8x32xf32> to vector<8x16xf32>
    %336 = vector.extract_strided_slice %321 {offsets = [0, 32], sizes = [8, 16], strides = [1, 1]} : vector<8x48xf32> to vector<8x16xf32>
    %337 = vector.extract_strided_slice %325 {offsets = [0, 32], sizes = [8, 16], strides = [1, 1]} : vector<8x48xf32> to vector<8x16xf32>
    %338 = arith.addf %337, %6 : vector<8x16xf32>
    %339 = arith.mulf %334, %338 : vector<8x16xf32>
    %340 = arith.addf %336, %339 : vector<8x16xf32>
    %341 = math.tanh %340 : vector<8x16xf32>
    %342 = arith.subf %283, %341 : vector<8x16xf32>
    %343 = arith.mulf %335, %342 : vector<8x16xf32>
    %344 = arith.addf %341, %343 : vector<8x16xf32>
    %c0_122 = arith.constant 0 : index
    %345 = arith.index_cast %318 : i32 to index
    %c0_123 = arith.constant 0 : index
    %c0_124 = arith.constant 0 : index
    %346 = vector.load %arg2[%c0_122, %345, %c0_123, %c0_124] : memref<1x8x8x48xf32, #tpu.memory_space<vmem>>, vector<1x1x8x48xf32>
    %347 = vector.shape_cast %346 : vector<1x1x8x48xf32> to vector<8x48xf32>
    %c1_125 = arith.constant 1 : index
    %c0_126 = arith.constant 0 : index
    %c0_127 = arith.constant 0 : index
    %348 = vector.load %arg3[%c1_125, %c0_126, %c0_127] : memref<2x16x48xbf16, #tpu.memory_space<vmem>>, vector<1x16x48xbf16>
    %349 = vector.shape_cast %348 : vector<1x16x48xbf16> to vector<16x48xbf16>
    %350 = arith.truncf %309 : vector<8x16xf32> to vector<8x16xbf16>
    %cst_128 = arith.constant dense<0.000000e+00> : vector<8x48xf32>
    %351 = tpu.matmul %350, %349, %cst_128 {dimension_numbers = #tpu.dot_dimension_numbers<[1], [0], [0], [1], [0, 0, 1, 1], [], []>} : vector<8x16xbf16>, vector<16x48xbf16>, vector<8x48xf32> -> vector<8x48xf32>
    %352 = vector.extract_strided_slice %347 {offsets = [0, 0], sizes = [8, 32], strides = [1, 1]} : vector<8x48xf32> to vector<8x32xf32>
    %353 = vector.extract_strided_slice %351 {offsets = [0, 0], sizes = [8, 32], strides = [1, 1]} : vector<8x48xf32> to vector<8x32xf32>
    %354 = arith.addf %352, %353 : vector<8x32xf32>
    %355 = arith.negf %354 : vector<8x32xf32>
    %356 = math.exp %355 : vector<8x32xf32>
    %cst_129 = arith.constant 1.000000e+00 : f32
    %357 = vector.broadcast %cst_129 : f32 to vector<8x32xf32>
    %358 = arith.addf %357, %356 : vector<8x32xf32>
    %359 = arith.divf %357, %358 : vector<8x32xf32>
    %360 = vector.extract_strided_slice %359 {offsets = [0, 0], sizes = [8, 16], strides = [1, 1]} : vector<8x32xf32> to vector<8x16xf32>
    %361 = vector.extract_strided_slice %359 {offsets = [0, 16], sizes = [8, 16], strides = [1, 1]} : vector<8x32xf32> to vector<8x16xf32>
    %362 = vector.extract_strided_slice %347 {offsets = [0, 32], sizes = [8, 16], strides = [1, 1]} : vector<8x48xf32> to vector<8x16xf32>
    %363 = vector.extract_strided_slice %351 {offsets = [0, 32], sizes = [8, 16], strides = [1, 1]} : vector<8x48xf32> to vector<8x16xf32>
    %364 = arith.addf %363, %10 : vector<8x16xf32>
    %365 = arith.mulf %360, %364 : vector<8x16xf32>
    %366 = arith.addf %362, %365 : vector<8x16xf32>
    %367 = math.tanh %366 : vector<8x16xf32>
    %368 = arith.subf %309, %367 : vector<8x16xf32>
    %369 = arith.mulf %361, %368 : vector<8x16xf32>
    %370 = arith.addf %367, %369 : vector<8x16xf32>
    %371 = arith.index_cast %c5_i32 : i32 to index
    %c0_130 = arith.constant 0 : index
    %c0_131 = arith.constant 0 : index
    %372 = vector.load %arg5[%371, %c0_130, %c0_131] : memref<8x8x16xf32, #tpu.memory_space<vmem>>, vector<1x8x16xf32>
    %373 = vector.shape_cast %372 : vector<1x8x16xf32> to vector<8x16xf32>
    %374 = vector.shape_cast %344 : vector<8x16xf32> to vector<1x8x16xf32>
    tpu.vector_store %arg5[%371, %c0_130, %c0_131], %374 {strides = array<i32>} : memref<8x8x16xf32, #tpu.memory_space<vmem>>, vector<1x8x16xf32>,
    %375 = arith.index_cast %318 : i32 to index
    %c0_132 = arith.constant 0 : index
    %c0_133 = arith.constant 0 : index
    %376 = vector.load %arg6[%375, %c0_132, %c0_133] : memref<8x8x16xf32, #tpu.memory_space<vmem>>, vector<1x8x16xf32>
    %377 = vector.shape_cast %376 : vector<1x8x16xf32> to vector<8x16xf32>
    %378 = vector.shape_cast %370 : vector<8x16xf32> to vector<1x8x16xf32>
    tpu.vector_store %arg6[%375, %c0_132, %c0_133], %378 {strides = array<i32>} : memref<8x8x16xf32, #tpu.memory_space<vmem>>, vector<1x8x16xf32>,
    %c6_i32 = arith.constant 6 : i32
    %c7_i32_134 = arith.constant 7 : i32
    %379 = arith.subi %c7_i32_134, %c6_i32 : i32
    %c0_135 = arith.constant 0 : index
    %380 = arith.index_cast %c6_i32 : i32 to index
    %c0_136 = arith.constant 0 : index
    %c0_137 = arith.constant 0 : index
    %381 = vector.load %arg1[%c0_135, %380, %c0_136, %c0_137] : memref<1x8x8x48xf32, #tpu.memory_space<vmem>>, vector<1x1x8x48xf32>
    %382 = vector.shape_cast %381 : vector<1x1x8x48xf32> to vector<8x48xf32>
    %c0_138 = arith.constant 0 : index
    %c0_139 = arith.constant 0 : index
    %c0_140 = arith.constant 0 : index
    %383 = vector.load %arg3[%c0_138, %c0_139, %c0_140] : memref<2x16x48xbf16, #tpu.memory_space<vmem>>, vector<1x16x48xbf16>
    %384 = vector.shape_cast %383 : vector<1x16x48xbf16> to vector<16x48xbf16>
    %385 = arith.truncf %344 : vector<8x16xf32> to vector<8x16xbf16>
    %cst_141 = arith.constant dense<0.000000e+00> : vector<8x48xf32>
    %386 = tpu.matmul %385, %384, %cst_141 {dimension_numbers = #tpu.dot_dimension_numbers<[1], [0], [0], [1], [0, 0, 1, 1], [], []>} : vector<8x16xbf16>, vector<16x48xbf16>, vector<8x48xf32> -> vector<8x48xf32>
    %387 = vector.extract_strided_slice %382 {offsets = [0, 0], sizes = [8, 32], strides = [1, 1]} : vector<8x48xf32> to vector<8x32xf32>
    %388 = vector.extract_strided_slice %386 {offsets = [0, 0], sizes = [8, 32], strides = [1, 1]} : vector<8x48xf32> to vector<8x32xf32>
    %389 = arith.addf %387, %388 : vector<8x32xf32>
    %390 = arith.negf %389 : vector<8x32xf32>
    %391 = math.exp %390 : vector<8x32xf32>
    %cst_142 = arith.constant 1.000000e+00 : f32
    %392 = vector.broadcast %cst_142 : f32 to vector<8x32xf32>
    %393 = arith.addf %392, %391 : vector<8x32xf32>
    %394 = arith.divf %392, %393 : vector<8x32xf32>
    %395 = vector.extract_strided_slice %394 {offsets = [0, 0], sizes = [8, 16], strides = [1, 1]} : vector<8x32xf32> to vector<8x16xf32>
    %396 = vector.extract_strided_slice %394 {offsets = [0, 16], sizes = [8, 16], strides = [1, 1]} : vector<8x32xf32> to vector<8x16xf32>
    %397 = vector.extract_strided_slice %382 {offsets = [0, 32], sizes = [8, 16], strides = [1, 1]} : vector<8x48xf32> to vector<8x16xf32>
    %398 = vector.extract_strided_slice %386 {offsets = [0, 32], sizes = [8, 16], strides = [1, 1]} : vector<8x48xf32> to vector<8x16xf32>
    %399 = arith.addf %398, %6 : vector<8x16xf32>
    %400 = arith.mulf %395, %399 : vector<8x16xf32>
    %401 = arith.addf %397, %400 : vector<8x16xf32>
    %402 = math.tanh %401 : vector<8x16xf32>
    %403 = arith.subf %344, %402 : vector<8x16xf32>
    %404 = arith.mulf %396, %403 : vector<8x16xf32>
    %405 = arith.addf %402, %404 : vector<8x16xf32>
    %c0_143 = arith.constant 0 : index
    %406 = arith.index_cast %379 : i32 to index
    %c0_144 = arith.constant 0 : index
    %c0_145 = arith.constant 0 : index
    %407 = vector.load %arg2[%c0_143, %406, %c0_144, %c0_145] : memref<1x8x8x48xf32, #tpu.memory_space<vmem>>, vector<1x1x8x48xf32>
    %408 = vector.shape_cast %407 : vector<1x1x8x48xf32> to vector<8x48xf32>
    %c1_146 = arith.constant 1 : index
    %c0_147 = arith.constant 0 : index
    %c0_148 = arith.constant 0 : index
    %409 = vector.load %arg3[%c1_146, %c0_147, %c0_148] : memref<2x16x48xbf16, #tpu.memory_space<vmem>>, vector<1x16x48xbf16>
    %410 = vector.shape_cast %409 : vector<1x16x48xbf16> to vector<16x48xbf16>
    %411 = arith.truncf %370 : vector<8x16xf32> to vector<8x16xbf16>
    %cst_149 = arith.constant dense<0.000000e+00> : vector<8x48xf32>
    %412 = tpu.matmul %411, %410, %cst_149 {dimension_numbers = #tpu.dot_dimension_numbers<[1], [0], [0], [1], [0, 0, 1, 1], [], []>} : vector<8x16xbf16>, vector<16x48xbf16>, vector<8x48xf32> -> vector<8x48xf32>
    %413 = vector.extract_strided_slice %408 {offsets = [0, 0], sizes = [8, 32], strides = [1, 1]} : vector<8x48xf32> to vector<8x32xf32>
    %414 = vector.extract_strided_slice %412 {offsets = [0, 0], sizes = [8, 32], strides = [1, 1]} : vector<8x48xf32> to vector<8x32xf32>
    %415 = arith.addf %413, %414 : vector<8x32xf32>
    %416 = arith.negf %415 : vector<8x32xf32>
    %417 = math.exp %416 : vector<8x32xf32>
    %cst_150 = arith.constant 1.000000e+00 : f32
    %418 = vector.broadcast %cst_150 : f32 to vector<8x32xf32>
    %419 = arith.addf %418, %417 : vector<8x32xf32>
    %420 = arith.divf %418, %419 : vector<8x32xf32>
    %421 = vector.extract_strided_slice %420 {offsets = [0, 0], sizes = [8, 16], strides = [1, 1]} : vector<8x32xf32> to vector<8x16xf32>
    %422 = vector.extract_strided_slice %420 {offsets = [0, 16], sizes = [8, 16], strides = [1, 1]} : vector<8x32xf32> to vector<8x16xf32>
    %423 = vector.extract_strided_slice %408 {offsets = [0, 32], sizes = [8, 16], strides = [1, 1]} : vector<8x48xf32> to vector<8x16xf32>
    %424 = vector.extract_strided_slice %412 {offsets = [0, 32], sizes = [8, 16], strides = [1, 1]} : vector<8x48xf32> to vector<8x16xf32>
    %425 = arith.addf %424, %10 : vector<8x16xf32>
    %426 = arith.mulf %421, %425 : vector<8x16xf32>
    %427 = arith.addf %423, %426 : vector<8x16xf32>
    %428 = math.tanh %427 : vector<8x16xf32>
    %429 = arith.subf %370, %428 : vector<8x16xf32>
    %430 = arith.mulf %422, %429 : vector<8x16xf32>
    %431 = arith.addf %428, %430 : vector<8x16xf32>
    %432 = arith.index_cast %c6_i32 : i32 to index
    %c0_151 = arith.constant 0 : index
    %c0_152 = arith.constant 0 : index
    %433 = vector.load %arg5[%432, %c0_151, %c0_152] : memref<8x8x16xf32, #tpu.memory_space<vmem>>, vector<1x8x16xf32>
    %434 = vector.shape_cast %433 : vector<1x8x16xf32> to vector<8x16xf32>
    %435 = vector.shape_cast %405 : vector<8x16xf32> to vector<1x8x16xf32>
    tpu.vector_store %arg5[%432, %c0_151, %c0_152], %435 {strides = array<i32>} : memref<8x8x16xf32, #tpu.memory_space<vmem>>, vector<1x8x16xf32>,
    %436 = arith.index_cast %379 : i32 to index
    %c0_153 = arith.constant 0 : index
    %c0_154 = arith.constant 0 : index
    %437 = vector.load %arg6[%436, %c0_153, %c0_154] : memref<8x8x16xf32, #tpu.memory_space<vmem>>, vector<1x8x16xf32>
    %438 = vector.shape_cast %437 : vector<1x8x16xf32> to vector<8x16xf32>
    %439 = vector.shape_cast %431 : vector<8x16xf32> to vector<1x8x16xf32>
    tpu.vector_store %arg6[%436, %c0_153, %c0_154], %439 {strides = array<i32>} : memref<8x8x16xf32, #tpu.memory_space<vmem>>, vector<1x8x16xf32>,
    %c7_i32_155 = arith.constant 7 : i32
    %c7_i32_156 = arith.constant 7 : i32
    %440 = arith.subi %c7_i32_156, %c7_i32_155 : i32
    %c0_157 = arith.constant 0 : index
    %441 = arith.index_cast %c7_i32_155 : i32 to index
    %c0_158 = arith.constant 0 : index
    %c0_159 = arith.constant 0 : index
    %442 = vector.load %arg1[%c0_157, %441, %c0_158, %c0_159] : memref<1x8x8x48xf32, #tpu.memory_space<vmem>>, vector<1x1x8x48xf32>
    %443 = vector.shape_cast %442 : vector<1x1x8x48xf32> to vector<8x48xf32>
    %c0_160 = arith.constant 0 : index
    %c0_161 = arith.constant 0 : index
    %c0_162 = arith.constant 0 : index
    %444 = vector.load %arg3[%c0_160, %c0_161, %c0_162] : memref<2x16x48xbf16, #tpu.memory_space<vmem>>, vector<1x16x48xbf16>
    %445 = vector.shape_cast %444 : vector<1x16x48xbf16> to vector<16x48xbf16>
    %446 = arith.truncf %405 : vector<8x16xf32> to vector<8x16xbf16>
    %cst_163 = arith.constant dense<0.000000e+00> : vector<8x48xf32>
    %447 = tpu.matmul %446, %445, %cst_163 {dimension_numbers = #tpu.dot_dimension_numbers<[1], [0], [0], [1], [0, 0, 1, 1], [], []>} : vector<8x16xbf16>, vector<16x48xbf16>, vector<8x48xf32> -> vector<8x48xf32>
    %448 = vector.extract_strided_slice %443 {offsets = [0, 0], sizes = [8, 32], strides = [1, 1]} : vector<8x48xf32> to vector<8x32xf32>
    %449 = vector.extract_strided_slice %447 {offsets = [0, 0], sizes = [8, 32], strides = [1, 1]} : vector<8x48xf32> to vector<8x32xf32>
    %450 = arith.addf %448, %449 : vector<8x32xf32>
    %451 = arith.negf %450 : vector<8x32xf32>
    %452 = math.exp %451 : vector<8x32xf32>
    %cst_164 = arith.constant 1.000000e+00 : f32
    %453 = vector.broadcast %cst_164 : f32 to vector<8x32xf32>
    %454 = arith.addf %453, %452 : vector<8x32xf32>
    %455 = arith.divf %453, %454 : vector<8x32xf32>
    %456 = vector.extract_strided_slice %455 {offsets = [0, 0], sizes = [8, 16], strides = [1, 1]} : vector<8x32xf32> to vector<8x16xf32>
    %457 = vector.extract_strided_slice %455 {offsets = [0, 16], sizes = [8, 16], strides = [1, 1]} : vector<8x32xf32> to vector<8x16xf32>
    %458 = vector.extract_strided_slice %443 {offsets = [0, 32], sizes = [8, 16], strides = [1, 1]} : vector<8x48xf32> to vector<8x16xf32>
    %459 = vector.extract_strided_slice %447 {offsets = [0, 32], sizes = [8, 16], strides = [1, 1]} : vector<8x48xf32> to vector<8x16xf32>
    %460 = arith.addf %459, %6 : vector<8x16xf32>
    %461 = arith.mulf %456, %460 : vector<8x16xf32>
    %462 = arith.addf %458, %461 : vector<8x16xf32>
    %463 = math.tanh %462 : vector<8x16xf32>
    %464 = arith.subf %405, %463 : vector<8x16xf32>
    %465 = arith.mulf %457, %464 : vector<8x16xf32>
    %466 = arith.addf %463, %465 : vector<8x16xf32>
    %c0_165 = arith.constant 0 : index
    %467 = arith.index_cast %440 : i32 to index
    %c0_166 = arith.constant 0 : index
    %c0_167 = arith.constant 0 : index
    %468 = vector.load %arg2[%c0_165, %467, %c0_166, %c0_167] : memref<1x8x8x48xf32, #tpu.memory_space<vmem>>, vector<1x1x8x48xf32>
    %469 = vector.shape_cast %468 : vector<1x1x8x48xf32> to vector<8x48xf32>
    %c1_168 = arith.constant 1 : index
    %c0_169 = arith.constant 0 : index
    %c0_170 = arith.constant 0 : index
    %470 = vector.load %arg3[%c1_168, %c0_169, %c0_170] : memref<2x16x48xbf16, #tpu.memory_space<vmem>>, vector<1x16x48xbf16>
    %471 = vector.shape_cast %470 : vector<1x16x48xbf16> to vector<16x48xbf16>
    %472 = arith.truncf %431 : vector<8x16xf32> to vector<8x16xbf16>
    %cst_171 = arith.constant dense<0.000000e+00> : vector<8x48xf32>
    %473 = tpu.matmul %472, %471, %cst_171 {dimension_numbers = #tpu.dot_dimension_numbers<[1], [0], [0], [1], [0, 0, 1, 1], [], []>} : vector<8x16xbf16>, vector<16x48xbf16>, vector<8x48xf32> -> vector<8x48xf32>
    %474 = vector.extract_strided_slice %469 {offsets = [0, 0], sizes = [8, 32], strides = [1, 1]} : vector<8x48xf32> to vector<8x32xf32>
    %475 = vector.extract_strided_slice %473 {offsets = [0, 0], sizes = [8, 32], strides = [1, 1]} : vector<8x48xf32> to vector<8x32xf32>
    %476 = arith.addf %474, %475 : vector<8x32xf32>
    %477 = arith.negf %476 : vector<8x32xf32>
    %478 = math.exp %477 : vector<8x32xf32>
    %cst_172 = arith.constant 1.000000e+00 : f32
    %479 = vector.broadcast %cst_172 : f32 to vector<8x32xf32>
    %480 = arith.addf %479, %478 : vector<8x32xf32>
    %481 = arith.divf %479, %480 : vector<8x32xf32>
    %482 = vector.extract_strided_slice %481 {offsets = [0, 0], sizes = [8, 16], strides = [1, 1]} : vector<8x32xf32> to vector<8x16xf32>
    %483 = vector.extract_strided_slice %481 {offsets = [0, 16], sizes = [8, 16], strides = [1, 1]} : vector<8x32xf32> to vector<8x16xf32>
    %484 = vector.extract_strided_slice %469 {offsets = [0, 32], sizes = [8, 16], strides = [1, 1]} : vector<8x48xf32> to vector<8x16xf32>
    %485 = vector.extract_strided_slice %473 {offsets = [0, 32], sizes = [8, 16], strides = [1, 1]} : vector<8x48xf32> to vector<8x16xf32>
    %486 = arith.addf %485, %10 : vector<8x16xf32>
    %487 = arith.mulf %482, %486 : vector<8x16xf32>
    %488 = arith.addf %484, %487 : vector<8x16xf32>
    %489 = math.tanh %488 : vector<8x16xf32>
    %490 = arith.subf %431, %489 : vector<8x16xf32>
    %491 = arith.mulf %483, %490 : vector<8x16xf32>
    %492 = arith.addf %489, %491 : vector<8x16xf32>
    %493 = arith.index_cast %c7_i32_155 : i32 to index
    %c0_173 = arith.constant 0 : index
    %c0_174 = arith.constant 0 : index
    %494 = vector.load %arg5[%493, %c0_173, %c0_174] : memref<8x8x16xf32, #tpu.memory_space<vmem>>, vector<1x8x16xf32>
    %495 = vector.shape_cast %494 : vector<1x8x16xf32> to vector<8x16xf32>
    %496 = vector.shape_cast %466 : vector<8x16xf32> to vector<1x8x16xf32>
    tpu.vector_store %arg5[%493, %c0_173, %c0_174], %496 {strides = array<i32>} : memref<8x8x16xf32, #tpu.memory_space<vmem>>, vector<1x8x16xf32>,
    %497 = arith.index_cast %440 : i32 to index
    %c0_175 = arith.constant 0 : index
    %c0_176 = arith.constant 0 : index
    %498 = vector.load %arg6[%497, %c0_175, %c0_176] : memref<8x8x16xf32, #tpu.memory_space<vmem>>, vector<1x8x16xf32>
    %499 = vector.shape_cast %498 : vector<1x8x16xf32> to vector<8x16xf32>
    %500 = vector.shape_cast %492 : vector<8x16xf32> to vector<1x8x16xf32>
    tpu.vector_store %arg6[%497, %c0_175, %c0_176], %500 {strides = array<i32>} : memref<8x8x16xf32, #tpu.memory_space<vmem>>, vector<1x8x16xf32>,
    %c8_i32 = arith.constant 8 : i32
    %c0_177 = arith.constant 0 : index
    %c0_178 = arith.constant 0 : index
    %501 = vector.load %arg7[%c0_177, %c0_178] : memref<8x16xf32, #tpu.memory_space<vmem>>, vector<8x16xf32>
    tpu.vector_store %arg7[%c0_177, %c0_178], %466 {strides = array<i32>} : memref<8x16xf32, #tpu.memory_space<vmem>>, vector<8x16xf32>,
    %c0_179 = arith.constant 0 : index
    %c0_180 = arith.constant 0 : index
    %502 = vector.load %arg8[%c0_179, %c0_180] : memref<8x16xf32, #tpu.memory_space<vmem>>, vector<8x16xf32>
    tpu.vector_store %arg8[%c0_179, %c0_180], %492 {strides = array<i32>} : memref<8x16xf32, #tpu.memory_space<vmem>>, vector<8x16xf32>,
    return
  }
  func.func @transform_0(%arg0: i32) -> (i32, i32, i32, i32) {
    %c0_i32 = arith.constant 0 : i32
    %c0_i32_0 = arith.constant 0 : i32
    %c0_i32_1 = arith.constant 0 : i32
    %c0_i32_2 = arith.constant 0 : i32
    return %c0_i32, %arg0, %c0_i32_0, %c0_i32_1 : i32, i32, i32, i32
  }
  func.func @transform_1(%arg0: i32) -> (i32, i32, i32, i32) {
    %c0_i32 = arith.constant 0 : i32
    %0 = arith.subi %c0_i32, %arg0 : i32
    %c1_i32 = arith.constant 1 : i32
    %c0_i32_0 = arith.constant 0 : i32
    %c0_i32_1 = arith.constant 0 : i32
    %c0_i32_2 = arith.constant 0 : i32
    return %c1_i32, %0, %c0_i32_0, %c0_i32_1 : i32, i32, i32, i32
  }
  func.func @transform_2(%arg0: i32) -> (i32, i32, i32) {
    %c0_i32 = arith.constant 0 : i32
    %c0_i32_0 = arith.constant 0 : i32
    %c0_i32_1 = arith.constant 0 : i32
    %c0_i32_2 = arith.constant 0 : i32
    return %c0_i32, %c0_i32_0, %c0_i32_1 : i32, i32, i32
  }
  func.func @transform_3(%arg0: i32) -> (i32, i32, i32) {
    %c0_i32 = arith.constant 0 : i32
    %c0_i32_0 = arith.constant 0 : i32
    %c0_i32_1 = arith.constant 0 : i32
    %c0_i32_2 = arith.constant 0 : i32
    return %c0_i32, %c0_i32_0, %c0_i32_1 : i32, i32, i32
  }
  func.func @transform_4(%arg0: i32) -> (i32, i32, i32) {
    %c0_i32 = arith.constant 0 : i32
    %c0_i32_0 = arith.constant 0 : i32
    %c0_i32_1 = arith.constant 0 : i32
    return %arg0, %c0_i32, %c0_i32_0 : i32, i32, i32
  }
  func.func @transform_5(%arg0: i32) -> (i32, i32, i32) {
    %c0_i32 = arith.constant 0 : i32
    %0 = arith.subi %c0_i32, %arg0 : i32
    %c0_i32_0 = arith.constant 0 : i32
    %c0_i32_1 = arith.constant 0 : i32
    %c0_i32_2 = arith.constant 0 : i32
    return %0, %c0_i32_0, %c0_i32_1 : i32, i32, i32
  }
}

</mosaic_0001>

<bundles_post_ra>
// kernel: _forward_impl.2
= control target key start
LH: loop header
LB: loop body
LE: loop exit
PB: predicated region body
PF: predicated region fallthrough
CT: control target
= control target key end

     0   :  { %vm63_vm0 = vcmask 130048   ;;  %v1965_v0 = vmov 0.0   ;;  %vm1966_vm1 = vmmov 0   ;;  %s1967_s26 = smov 32   ;;  %s1969_s6 = smov 16   ;;  %s2444_s2 = inlined_call_operand.vmem [shape: bf16[2,16,48], index: 2, kind: input, shape index: {}]   ;;  %s2445_s3 = inlined_call_operand.vmem [shape: f32[2,1,16], index: 3, kind: input, shape index: {}]   ;;  %s2446_s0 = inlined_call_operand.vmem [shape: f32[2,8,8,48], index: 0, kind: input, shape index: {}, may-alias: {0,1}]   ;;  %s2447_s1 = inlined_call_operand.vmem [shape: f32[2,8,8,48], index: 1, kind: input, shape index: {}, may-alias: {0,1}]   ;;  %s2448_s4 = inlined_call_operand.vmem [shape: f32[8,8,16], index: 4, kind: output, shape index: {0}]   ;;  %s2449_s5 = inlined_call_operand.vmem [shape: f32[8,8,16], index: 5, kind: output, shape index: {1}]  }
   0x1   :  { %1751 = vmatprep.subr.bf16.mxu0 %v1965_v0  ;;  %v1853_v1 = vld [vmem:[%s2444_s2] sm:$0xff]   ;;  %1757 = vmatprep.subr.bf16.mxu1 %v1965_v0  ;;  %64 = vst.msk [vmem:[#allocation2] sm:$0xff] %vm63_vm0, %v1965_v0  ;;  %65 = vst.msk [vmem:[#allocation3] sm:$0xff] %vm63_vm0, %v1965_v0  ;;  %v1854_v2 = vld [vmem:[%s2444_s2 + $0x8] sm:$0xff]   ;;  %s1970_s15 = smov 112  }
   0x2   :  { %1753 = vmatprep.mubr.msk.bf16.mxu0 %vm1966_vm1, %v1965_v0  ;;  %1759 = vmatprep.mubr.msk.bf16.mxu1 %vm1966_vm1, %v1965_v0  ;;  %v1623_v3 = vld [vmem:[%s2445_s3] ss:$0 sm:$0xff]  ;;  %v1625_v4 = vld [vmem:[%s2445_s3 + $0x1] ss:$0 sm:$0xff]  ;;  %s1968_s3 = smov 96   ;;  %v1629_v23 = vld [vmem:[%s2447_s1 + $0x78] sm:$0xff] }
   0x3   :  { %1752 = vmatpush3.bf16.msra.mxu0 %v1853_v1  ;;  %1758 = vmatpush3.bf16.msra.mxu1 %v1854_v2  ;;  %v81_v21 = vld [vmem:[%s2446_s0] sm:$0xff]  ;;  %v1856_v48 = vld [vmem:[%s2444_s2 + $0x8] sm:$0xff]  }
   0x4   :  { %142 = vrot.lane.b32.xlu0 %v1623_v3, %s1967_s26  ;;  %1763 = vmatprep.subr.bf16.mxu0 %v1965_v0  ;;  %v1855_v47 = vld [vmem:[%s2444_s2] sm:$0xff]  }
   0x5   :  { %1769 = vmatprep.subr.bf16.mxu1 %v1965_v0 }
   0x8   :  { %v79_v5 = vld [vmem:[#allocation2] sm:$0xff]  ;;  %v2026_v6 = vld [vmem:[#allocation3] sm:$0xff]  ;;  %234 = vrot.lane.b32.xlu0 %v1625_v4, %s1967_s26 }
   0x9   :  { %v84_v7 = vpack.c.bf16 %v79_v5, %v79_v5  ;;  %v177_v8 = vpack.c.bf16 %v2026_v6, %v2026_v6 }
   0xb   :  { %1754 = vmatmul.mubr.msk.bf16.vlgmr.msra.gmra.mrb[0].mxu0 %vm63_vm0, %v84_v7  ;;  %1760 = vmatmul.mubr.msk.bf16.vlgmr.msra.gmra.mrb[0].mxu1 %vm63_vm0, %v177_v8  ;;  %v1636_v8 = vld [vmem:[%s2446_s0 + $0x8] sm:$0xff] }
   0xc   :  { %1765 = vmatprep.mubr.msk.bf16.mxu0 %vm1966_vm1, %v1965_v0  ;;  %1771 = vmatprep.mubr.msk.bf16.mxu1 %vm1966_vm1, %v1965_v0 }
   0xd   :  { %1764 = vmatpush3.bf16.msra.mxu0 %v1855_v47  ;;  %1770 = vmatpush3.bf16.msra.mxu1 %v1856_v48 }
   0xe   :  { %1775 = vmatprep.subr.bf16.mxu0 %v1965_v0  ;;  %1781 = vmatprep.subr.bf16.mxu1 %v1965_v0 }
  0x76   :  { %v2037_v9 = vpop.permute.xlu0 %142 }
  0x7a   :  { %v2039_v10 = vpop.permute.xlu0 %234 }
  0xde   :  { %v129_v11 = vpop.f32.mrb[0].mxu0  ;;  %v221_v12 = vpop.f32.mrb[0].mxu1 }
  0xdf   :  { %v1755_v13 = vpop.f32.mrb[1].mxu0  ;;  %v1761_v14 = vpop.f32.mrb[1].mxu1  ;;  %v145_v15 = vadd.f32 %v2037_v9, %v129_v11  ;;  %v237_v20 = vadd.f32 %v2039_v10, %v221_v12  ;;  %v135_v22 = vadd.f32 %v129_v11, %v81_v21  ;;  %v227_v25 = vadd.f32 %v1629_v23, %v221_v12  ;;  %v1640_v12 = vld [vmem:[%s2447_s1 + $0x70] sm:$0xff] }
  0xe0   :  { %v132_v16 = vpop.f32.mrb[2].mxu0  ;;  %v224_v17 = vpop.f32.mrb[2].mxu1 }
  0xe1   :  { %147 = vrot.lane.b32.xlu1 %v145_v15, %s1968_s3  ;;  %v1756_v18 = vpop.f32.mrb[3].mxu0  ;;  %v1762_v19 = vpop.f32.mrb[3].mxu1  ;;  %v1628_v24 = vmul.f32 -1.442695, %v135_v22  ;;  %v1634_v26 = vmul.f32 -1.442695, %v227_v25 }
  0xe3   :  { %1869 = vpow2.f32 %v1628_v24 }
  0xe4   :  { %1871 = vpow2.f32 %v1634_v26 }
  0xe5   :  { %239 = vrot.lane.b32.xlu1 %v237_v20, %s1968_s3 }
  0xed   :  { %v1870_v27 = vpop.eup %1869 }
  0xee   :  { %v139_v28 = vadd.f32 1.0, %v1870_v27  ;;  %v1872_v29 = vpop.eup %1871 }
  0xef   :  { %v231_v30 = vadd.f32 1.0, %v1872_v29 }
  0xf0   :  { %1873 = vrcp.f32 %v139_v28 }
  0xf1   :  { %1875 = vrcp.f32 %v231_v30 }
  0xfa   :  { %v1874_v31 = vpop.eup %1873 }
  0xfb   :  { %v1876_v34 = vpop.eup %1875 }
 0x153   :  { %v148_v32 = vpop.permute.xlu1 %147 }
 0x154   :  { %v150_v33 = vmul.f32 %v1874_v31, %v148_v32 }
 0x156   :  { %152 = vrot.lane.b32.xlu0 %v150_v33, %s1967_s26 }
 0x157   :  { %v240_v35 = vpop.permute.xlu1 %239 }
 0x158   :  { %v242_v36 = vmul.f32 %v1876_v34, %v240_v35  ;;  %v1858_v35 = vld [vmem:[%s2444_s2 + $0x8] sm:$0xff]  }
 0x15a   :  { %244 = vrot.lane.b32.xlu1 %v242_v36, %s1967_s26 }
 0x1c8   :  { %v153_v37 = vpop.permute.xlu0 %152 }
 0x1c9   :  { %v155_v38 = vadd.f32 %v153_v37, %v81_v21 }
 0x1cb   :  { %1877 = vtanh.f32 %v155_v38 }
 0x1cc   :  { %v245_v39 = vpop.permute.xlu1 %244 }
 0x1cd   :  { %v247_v40 = vadd.f32 %v1629_v23, %v245_v39 }
 0x1cf   :  { %1879 = vtanh.f32 %v247_v40 }
 0x1d5   :  { %v1878_v41 = vpop.eup %1877 }
 0x1d6   :  { %158 = vrot.lane.b32.xlu0 %v1878_v41, %s1968_s3 }
 0x1d9   :  { %v1880_v42 = vpop.eup %1879 }
 0x1da   :  { %250 = vrot.lane.b32.xlu1 %v1880_v42, %s1968_s3 }
 0x248   :  { %v159_v43 = vpop.permute.xlu0 %158 }
 0x249   :  { %v161_v44 = vsub.f32 %v79_v5, %v159_v43 }
 0x24b   :  { %163 = vrot.lane.b32.xlu0 %v161_v44, %s1969_s6 }
 0x24c   :  { %v251_v45 = vpop.permute.xlu1 %250 }
 0x24d   :  { %v253_v46 = vsub.f32 %v2026_v6, %v251_v45 }
 0x24f   :  { %255 = vrot.lane.b32.xlu1 %v253_v46, %s1969_s6 }
 0x2bd   :  { %v164_v49 = vpop.permute.xlu0 %163 }
 0x2be   :  { %v166_v50 = vmul.f32 %v1874_v31, %v164_v49 }
 0x2c0   :  { %168 = vrot.lane.b32.xlu0 %v166_v50, %s1969_s6 }
 0x2c1   :  { %v256_v51 = vpop.permute.xlu1 %255 }
 0x2c2   :  { %v258_v52 = vmul.f32 %v1876_v34, %v256_v51  ;;  %v1857_v34 = vld [vmem:[%s2444_s2] sm:$0xff]  }
 0x2c4   :  { %260 = vrot.lane.b32.xlu1 %v258_v52, %s1969_s6 }
 0x332   :  { %v169_v53 = vpop.permute.xlu0 %168 }
 0x333   :  { %v2068_v54 = vadd.f32 %v1878_v41, %v169_v53 }
 0x335   :  { %v279_v55 = vpack.c.bf16 %v2068_v54, %v2068_v54 }
 0x336   :  { %v261_v56 = vpop.permute.xlu1 %260 }
 0x337   :  { %v2072_v57 = vadd.f32 %v1880_v42, %v261_v56  ;;  %281 = vrot.lane.b32.xlu0 %v279_v55, %s1968_s3 }
 0x339   :  { %v366_v58 = vpack.c.bf16 %v2072_v57, %v2072_v57 }
 0x33b   :  { %368 = vrot.lane.b32.xlu1 %v366_v58, %s1968_s3 }
 0x3a9   :  { %v282_v59 = vpop.permute.xlu0 %281 }
 0x3aa   :  { %1766 = vmatmul.mubr.msk.bf16.vlgmr.msra.gmra.mrb[4].mxu0 %vm63_vm0, %v282_v59 }
 0x3ab   :  { %1777 = vmatprep.mubr.msk.bf16.mxu0 %vm1966_vm1, %v1965_v0  ;;  %1776 = vmatpush3.bf16.msra.mxu0 %v1857_v34 }
 0x3ac   :  { %1787 = vmatprep.subr.bf16.mxu0 %v1965_v0 }
 0x3ad   :  { %v369_v60 = vpop.permute.xlu1 %368 }
 0x3ae   :  { %1772 = vmatmul.mubr.msk.bf16.vlgmr.msra.gmra.mrb[4].mxu1 %vm63_vm0, %v369_v60  ;;  %v1648_v60 = vld [vmem:[%s2446_s0 + $0x10] sm:$0xff] }
 0x3af   :  { %1783 = vmatprep.mubr.msk.bf16.mxu1 %vm1966_vm1, %v1965_v0  ;;  %1782 = vmatpush3.bf16.msra.mxu1 %v1858_v35 }
 0x3b0   :  { %1793 = vmatprep.subr.bf16.mxu1 %v1965_v0 }
 0x47d   :  { %v326_v61 = vpop.f32.mrb[4].mxu0 }
 0x47e   :  { %v339_v62 = vadd.f32 %v326_v61, %v2037_v9  ;;  %v1767_v63 = vpop.f32.mrb[5].mxu0  ;;  %v332_v11 = vadd.f32 %v1636_v8, %v326_v61 }
 0x47f   :  { %v329_v1 = vpop.f32.mrb[6].mxu0 }
 0x480   :  { %341 = vrot.lane.b32.xlu0 %v339_v62, %s1968_s3  ;;  %v1768_v2 = vpop.f32.mrb[7].mxu0  ;;  %v1639_v13 = vmul.f32 -1.442695, %v332_v11  ;;  %v1652_v62 = vld [vmem:[%s2447_s1 + $0x68] sm:$0xff] }
 0x481   :  { %v413_v3 = vpop.f32.mrb[4].mxu1 }
 0x482   :  { %v426_v4 = vadd.f32 %v413_v3, %v2039_v10  ;;  %v1773_v5 = vpop.f32.mrb[5].mxu1  ;;  %v419_v14 = vadd.f32 %v1640_v12, %v413_v3  ;;  %1881 = vpow2.f32 %v1639_v13 }
 0x483   :  { %v416_v6 = vpop.f32.mrb[6].mxu1 }
 0x484   :  { %428 = vrot.lane.b32.xlu1 %v426_v4, %s1968_s3  ;;  %v1774_v7 = vpop.f32.mrb[7].mxu1  ;;  %v1645_v15 = vmul.f32 -1.442695, %v419_v14 }
 0x486   :  { %1883 = vpow2.f32 %v1645_v15 }
 0x48c   :  { %v1882_v16 = vpop.eup %1881 }
 0x48d   :  { %v336_v17 = vadd.f32 1.0, %v1882_v16 }
 0x48f   :  { %1885 = vrcp.f32 %v336_v17 }
 0x490   :  { %v1884_v18 = vpop.eup %1883 }
 0x491   :  { %v423_v19 = vadd.f32 1.0, %v1884_v18 }
 0x493   :  { %1887 = vrcp.f32 %v423_v19 }
 0x499   :  { %v1886_v20 = vpop.eup %1885 }
 0x49d   :  { %v1888_v23 = vpop.eup %1887 }
 0x4f2   :  { %v342_v21 = vpop.permute.xlu0 %341 }
 0x4f3   :  { %v344_v22 = vmul.f32 %v1886_v20, %v342_v21 }
 0x4f5   :  { %346 = vrot.lane.b32.xlu0 %v344_v22, %s1967_s26 }
 0x4f6   :  { %v429_v24 = vpop.permute.xlu1 %428 }
 0x4f7   :  { %v431_v25 = vmul.f32 %v1888_v23, %v429_v24  ;;  %v1860_v24 = vld [vmem:[%s2444_s2 + $0x8] sm:$0xff]  }
 0x4f9   :  { %433 = vrot.lane.b32.xlu1 %v431_v25, %s1967_s26 }
 0x567   :  { %v347_v26 = vpop.permute.xlu0 %346 }
 0x568   :  { %v349_v27 = vadd.f32 %v1636_v8, %v347_v26 }
 0x56a   :  { %1889 = vtanh.f32 %v349_v27 }
 0x56b   :  { %v434_v28 = vpop.permute.xlu1 %433 }
 0x56c   :  { %v436_v29 = vadd.f32 %v1640_v12, %v434_v28 }
 0x56e   :  { %1891 = vtanh.f32 %v436_v29 }
 0x574   :  { %v1890_v30 = vpop.eup %1889 }
 0x575   :  { %v351_v31 = vsub.f32 %v2068_v54, %v1890_v30 }
 0x577   :  { %353 = vrot.lane.b32.xlu0 %v351_v31, %s1970_s15 }
 0x578   :  { %v1892_v32 = vpop.eup %1891 }
 0x579   :  { %v438_v33 = vsub.f32 %v2072_v57, %v1892_v32 }
 0x57b   :  { %440 = vrot.lane.b32.xlu1 %v438_v33, %s1970_s15 }
 0x5e9   :  { %v354_v36 = vpop.permute.xlu0 %353 }
 0x5ea   :  { %v356_v37 = vmul.f32 %v1886_v20, %v354_v36 }
 0x5ec   :  { %358 = vrot.lane.b32.xlu0 %v356_v37, %s1969_s6 }
 0x5ed   :  { %v441_v38 = vpop.permute.xlu1 %440 }
 0x5ee   :  { %v443_v39 = vmul.f32 %v1888_v23, %v441_v38  ;;  %v1859_v23 = vld [vmem:[%s2444_s2] sm:$0xff]  }
 0x5f0   :  { %445 = vrot.lane.b32.xlu1 %v443_v39, %s1969_s6 }
 0x65e   :  { %v359_v40 = vpop.permute.xlu0 %358 }
 0x65f   :  { %v2110_v41 = vadd.f32 %v1890_v30, %v359_v40 }
 0x661   :  { %v465_v42 = vpack.c.bf16 %v2110_v41, %v2110_v41 }
 0x662   :  { %v446_v43 = vpop.permute.xlu1 %445 }
 0x663   :  { %v2114_v44 = vadd.f32 %v1892_v32, %v446_v43  ;;  %467 = vrot.lane.b32.xlu0 %v465_v42, %s1968_s3 }
 0x665   :  { %v552_v45 = vpack.c.bf16 %v2114_v44, %v2114_v44 }
 0x667   :  { %554 = vrot.lane.b32.xlu1 %v552_v45, %s1968_s3 }
 0x6d5   :  { %v468_v46 = vpop.permute.xlu0 %467 }
 0x6d6   :  { %1778 = vmatmul.mubr.msk.bf16.vlgmr.msra.gmra.mrb[8].mxu0 %vm63_vm0, %v468_v46 }
 0x6d7   :  { %1789 = vmatprep.mubr.msk.bf16.mxu0 %vm1966_vm1, %v1965_v0  ;;  %1788 = vmatpush3.bf16.msra.mxu0 %v1859_v23 }
 0x6d8   :  { %1799 = vmatprep.subr.bf16.mxu0 %v1965_v0 }
 0x6d9   :  { %v555_v47 = vpop.permute.xlu1 %554 }
 0x6da   :  { %1784 = vmatmul.mubr.msk.bf16.vlgmr.msra.gmra.mrb[8].mxu1 %vm63_vm0, %v555_v47 }
 0x6db   :  { %1795 = vmatprep.mubr.msk.bf16.mxu1 %vm1966_vm1, %v1965_v0  ;;  %1794 = vmatpush3.bf16.msra.mxu1 %v1860_v24 }
 0x6dc   :  { %1805 = vmatprep.subr.bf16.mxu1 %v1965_v0 }
 0x7a9   :  { %v512_v48 = vpop.f32.mrb[8].mxu0 }
 0x7aa   :  { %v525_v49 = vadd.f32 %v512_v48, %v2037_v9  ;;  %v1779_v50 = vpop.f32.mrb[9].mxu0  ;;  %v518_v61 = vadd.f32 %v1648_v60, %v512_v48 }
 0x7ab   :  { %v515_v51 = vpop.f32.mrb[10].mxu0 }
 0x7ac   :  { %527 = vrot.lane.b32.xlu0 %v525_v49, %s1968_s3  ;;  %v1780_v52 = vpop.f32.mrb[11].mxu0  ;;  %v1651_v63 = vmul.f32 -1.442695, %v518_v61  ;;  %v1660_v49 = vld [vmem:[%s2446_s0 + $0x18] sm:$0xff]  ;;  %v1664_v51 = vld [vmem:[%s2447_s1 + $0x60] sm:$0xff] }
 0x7ad   :  { %v599_v53 = vpop.f32.mrb[8].mxu1 }
 0x7ae   :  { %v612_v55 = vadd.f32 %v599_v53, %v2039_v10  ;;  %v1785_v56 = vpop.f32.mrb[9].mxu1  ;;  %v605_v1 = vadd.f32 %v1652_v62, %v599_v53  ;;  %1893 = vpow2.f32 %v1651_v63 }
 0x7af   :  { %v602_v58 = vpop.f32.mrb[10].mxu1 }
 0x7b0   :  { %614 = vrot.lane.b32.xlu1 %v612_v55, %s1968_s3  ;;  %v1786_v59 = vpop.f32.mrb[11].mxu1  ;;  %v1657_v2 = vmul.f32 -1.442695, %v605_v1 }
 0x7b2   :  { %1895 = vpow2.f32 %v1657_v2 }
 0x7b8   :  { %v1894_v3 = vpop.eup %1893 }
 0x7b9   :  { %v522_v4 = vadd.f32 1.0, %v1894_v3 }
 0x7bb   :  { %1897 = vrcp.f32 %v522_v4 }
 0x7bc   :  { %v1896_v5 = vpop.eup %1895 }
 0x7bd   :  { %v609_v6 = vadd.f32 1.0, %v1896_v5 }
 0x7bf   :  { %1899 = vrcp.f32 %v609_v6 }
 0x7c5   :  { %v1898_v7 = vpop.eup %1897 }
 0x7c9   :  { %v1900_v12 = vpop.eup %1899 }
 0x81e   :  { %v528_v8 = vpop.permute.xlu0 %527 }
 0x81f   :  { %v530_v11 = vmul.f32 %v1898_v7, %v528_v8 }
 0x821   :  { %532 = vrot.lane.b32.xlu0 %v530_v11, %s1967_s26 }
 0x822   :  { %v615_v13 = vpop.permute.xlu1 %614 }
 0x823   :  { %v617_v14 = vmul.f32 %v1900_v12, %v615_v13 }
 0x825   :  { %619 = vrot.lane.b32.xlu1 %v617_v14, %s1967_s26  ;;  %v1861_v14 = vld [vmem:[%s2444_s2] sm:$0xff]  }
 0x893   :  { %v533_v15 = vpop.permute.xlu0 %532 }
 0x894   :  { %v535_v16 = vadd.f32 %v1648_v60, %v533_v15  ;;  %v1862_v15 = vld [vmem:[%s2444_s2 + $0x8] sm:$0xff]  }
 0x896   :  { %1901 = vtanh.f32 %v535_v16 }
 0x897   :  { %v620_v17 = vpop.permute.xlu1 %619 }
 0x898   :  { %v622_v18 = vadd.f32 %v1652_v62, %v620_v17 }
 0x89a   :  { %1903 = vtanh.f32 %v622_v18 }
 0x8a0   :  { %v1902_v19 = vpop.eup %1901 }
 0x8a1   :  { %v537_v20 = vsub.f32 %v2110_v41, %v1902_v19 }
 0x8a3   :  { %539 = vrot.lane.b32.xlu0 %v537_v20, %s1970_s15 }
 0x8a4   :  { %v1904_v21 = vpop.eup %1903 }
 0x8a5   :  { %v624_v22 = vsub.f32 %v2114_v44, %v1904_v21 }
 0x8a7   :  { %626 = vrot.lane.b32.xlu1 %v624_v22, %s1970_s15 }
 0x915   :  { %v540_v25 = vpop.permute.xlu0 %539 }
 0x916   :  { %v542_v26 = vmul.f32 %v1898_v7, %v540_v25 }
 0x918   :  { %544 = vrot.lane.b32.xlu0 %v542_v26, %s1969_s6 }
 0x919   :  { %v627_v27 = vpop.permute.xlu1 %626 }
 0x91a   :  { %v629_v28 = vmul.f32 %v1900_v12, %v627_v27 }
 0x91c   :  { %631 = vrot.lane.b32.xlu1 %v629_v28, %s1969_s6 }
 0x98a   :  { %v545_v29 = vpop.permute.xlu0 %544 }
 0x98b   :  { %v2152_v30 = vadd.f32 %v1902_v19, %v545_v29 }
 0x98d   :  { %v651_v31 = vpack.c.bf16 %v2152_v30, %v2152_v30 }
 0x98e   :  { %v632_v32 = vpop.permute.xlu1 %631 }
 0x98f   :  { %v2156_v33 = vadd.f32 %v1904_v21, %v632_v32  ;;  %653 = vrot.lane.b32.xlu0 %v651_v31, %s1968_s3 }
 0x991   :  { %v738_v34 = vpack.c.bf16 %v2156_v33, %v2156_v33 }
 0x993   :  { %740 = vrot.lane.b32.xlu1 %v738_v34, %s1968_s3 }
 0xa01   :  { %v654_v35 = vpop.permute.xlu0 %653 }
 0xa02   :  { %1790 = vmatmul.mubr.msk.bf16.vlgmr.msra.gmra.mrb[12].mxu0 %vm63_vm0, %v654_v35 }
 0xa03   :  { %1801 = vmatprep.mubr.msk.bf16.mxu0 %vm1966_vm1, %v1965_v0  ;;  %1800 = vmatpush3.bf16.msra.mxu0 %v1861_v14 }
 0xa04   :  { %1811 = vmatprep.subr.bf16.mxu0 %v1965_v0 }
 0xa05   :  { %v741_v36 = vpop.permute.xlu1 %740 }
 0xa06   :  { %1796 = vmatmul.mubr.msk.bf16.vlgmr.msra.gmra.mrb[12].mxu1 %vm63_vm0, %v741_v36 }
 0xa07   :  { %1807 = vmatprep.mubr.msk.bf16.mxu1 %vm1966_vm1, %v1965_v0  ;;  %1806 = vmatpush3.bf16.msra.mxu1 %v1862_v15 }
 0xa08   :  { %1817 = vmatprep.subr.bf16.mxu1 %v1965_v0 }
 0xad5   :  { %v698_v37 = vpop.f32.mrb[12].mxu0 }
 0xad6   :  { %v711_v38 = vadd.f32 %v698_v37, %v2037_v9  ;;  %v1791_v39 = vpop.f32.mrb[13].mxu0  ;;  %v704_v50 = vadd.f32 %v1660_v49, %v698_v37 }
 0xad7   :  { %v701_v40 = vpop.f32.mrb[14].mxu0 }
 0xad8   :  { %713 = vrot.lane.b32.xlu0 %v711_v38, %s1968_s3  ;;  %v1792_v42 = vpop.f32.mrb[15].mxu0  ;;  %v1663_v52 = vmul.f32 -1.442695, %v704_v50  ;;  %v1672_v40 = vld [vmem:[%s2446_s0 + $0x20] sm:$0xff] }
 0xad9   :  { %v785_v43 = vpop.f32.mrb[12].mxu1 }
 0xada   :  { %v798_v45 = vadd.f32 %v785_v43, %v2039_v10  ;;  %v1797_v46 = vpop.f32.mrb[13].mxu1  ;;  %v791_v53 = vadd.f32 %v1664_v51, %v785_v43  ;;  %1905 = vpow2.f32 %v1663_v52  ;;  %v1676_v43 = vld [vmem:[%s2447_s1 + $0x58] sm:$0xff] }
 0xadb   :  { %v788_v47 = vpop.f32.mrb[14].mxu1 }
 0xadc   :  { %800 = vrot.lane.b32.xlu1 %v798_v45, %s1968_s3  ;;  %v1798_v48 = vpop.f32.mrb[15].mxu1  ;;  %v1669_v55 = vmul.f32 -1.442695, %v791_v53 }
 0xade   :  { %1907 = vpow2.f32 %v1669_v55 }
 0xae4   :  { %v1906_v56 = vpop.eup %1905 }
 0xae5   :  { %v708_v58 = vadd.f32 1.0, %v1906_v56 }
 0xae7   :  { %1909 = vrcp.f32 %v708_v58 }
 0xae8   :  { %v1908_v59 = vpop.eup %1907 }
 0xae9   :  { %v795_v60 = vadd.f32 1.0, %v1908_v59 }
 0xaeb   :  { %1911 = vrcp.f32 %v795_v60 }
 0xaf1   :  { %v1910_v61 = vpop.eup %1909 }
 0xaf5   :  { %v1912_v1 = vpop.eup %1911 }
 0xb4a   :  { %v714_v62 = vpop.permute.xlu0 %713 }
 0xb4b   :  { %v716_v63 = vmul.f32 %v1910_v61, %v714_v62 }
 0xb4d   :  { %718 = vrot.lane.b32.xlu0 %v716_v63, %s1967_s26 }
 0xb4e   :  { %v801_v2 = vpop.permute.xlu1 %800 }
 0xb4f   :  { %v803_v3 = vmul.f32 %v1912_v1, %v801_v2 }
 0xb51   :  { %805 = vrot.lane.b32.xlu1 %v803_v3, %s1967_s26 }
 0xbbf   :  { %v719_v4 = vpop.permute.xlu0 %718 }
 0xbc0   :  { %v721_v5 = vadd.f32 %v1660_v49, %v719_v4 }
 0xbc2   :  { %1913 = vtanh.f32 %v721_v5  ;;  %v1863_v5 = vld [vmem:[%s2444_s2] sm:$0xff]  }
 0xbc3   :  { %v806_v6 = vpop.permute.xlu1 %805 }
 0xbc4   :  { %v808_v7 = vadd.f32 %v1664_v51, %v806_v6  ;;  %v1864_v6 = vld [vmem:[%s2444_s2 + $0x8] sm:$0xff]  }
 0xbc6   :  { %1915 = vtanh.f32 %v808_v7 }
 0xbcc   :  { %v1914_v8 = vpop.eup %1913 }
 0xbcd   :  { %v723_v11 = vsub.f32 %v2152_v30, %v1914_v8 }
 0xbcf   :  { %725 = vrot.lane.b32.xlu0 %v723_v11, %s1970_s15 }
 0xbd0   :  { %v1916_v12 = vpop.eup %1915 }
 0xbd1   :  { %v810_v13 = vsub.f32 %v2156_v33, %v1916_v12 }
 0xbd3   :  { %812 = vrot.lane.b32.xlu1 %v810_v13, %s1970_s15 }
 0xc41   :  { %v726_v16 = vpop.permute.xlu0 %725 }
 0xc42   :  { %v728_v17 = vmul.f32 %v1910_v61, %v726_v16 }
 0xc44   :  { %730 = vrot.lane.b32.xlu0 %v728_v17, %s1969_s6 }
 0xc45   :  { %v813_v18 = vpop.permute.xlu1 %812 }
 0xc46   :  { %v815_v19 = vmul.f32 %v1912_v1, %v813_v18 }
 0xc48   :  { %817 = vrot.lane.b32.xlu1 %v815_v19, %s1969_s6 }
 0xcb6   :  { %v731_v20 = vpop.permute.xlu0 %730 }
 0xcb7   :  { %v2194_v21 = vadd.f32 %v1914_v8, %v731_v20 }
 0xcb9   :  { %v837_v22 = vpack.c.bf16 %v2194_v21, %v2194_v21 }
 0xcba   :  { %v818_v23 = vpop.permute.xlu1 %817 }
 0xcbb   :  { %v2198_v24 = vadd.f32 %v1916_v12, %v818_v23  ;;  %839 = vrot.lane.b32.xlu0 %v837_v22, %s1968_s3 }
 0xcbd   :  { %v924_v25 = vpack.c.bf16 %v2198_v24, %v2198_v24 }
 0xcbf   :  { %926 = vrot.lane.b32.xlu1 %v924_v25, %s1968_s3 }
 0xd2d   :  { %v840_v26 = vpop.permute.xlu0 %839 }
 0xd2e   :  { %1802 = vmatmul.mubr.msk.bf16.vlgmr.msra.gmra.mrb[16].mxu0 %vm63_vm0, %v840_v26 }
 0xd2f   :  { %1813 = vmatprep.mubr.msk.bf16.mxu0 %vm1966_vm1, %v1965_v0  ;;  %1812 = vmatpush3.bf16.msra.mxu0 %v1863_v5 }
 0xd30   :  { %1823 = vmatprep.subr.bf16.mxu0 %v1965_v0 }
 0xd31   :  { %v927_v27 = vpop.permute.xlu1 %926 }
 0xd32   :  { %1808 = vmatmul.mubr.msk.bf16.vlgmr.msra.gmra.mrb[16].mxu1 %vm63_vm0, %v927_v27 }
 0xd33   :  { %1819 = vmatprep.mubr.msk.bf16.mxu1 %vm1966_vm1, %v1965_v0  ;;  %1818 = vmatpush3.bf16.msra.mxu1 %v1864_v6 }
 0xd34   :  { %1829 = vmatprep.subr.bf16.mxu1 %v1965_v0 }
 0xe01   :  { %v884_v28 = vpop.f32.mrb[16].mxu0 }
 0xe02   :  { %v897_v29 = vadd.f32 %v884_v28, %v2037_v9  ;;  %v1803_v31 = vpop.f32.mrb[17].mxu0  ;;  %v890_v42 = vadd.f32 %v1672_v40, %v884_v28 }
 0xe03   :  { %v887_v32 = vpop.f32.mrb[18].mxu0 }
 0xe04   :  { %899 = vrot.lane.b32.xlu0 %v897_v29, %s1968_s3  ;;  %v1804_v34 = vpop.f32.mrb[19].mxu0  ;;  %v1675_v45 = vmul.f32 -1.442695, %v890_v42 }
 0xe05   :  { %v971_v35 = vpop.f32.mrb[16].mxu1 }
 0xe06   :  { %v984_v36 = vadd.f32 %v971_v35, %v2039_v10  ;;  %v1809_v37 = vpop.f32.mrb[17].mxu1  ;;  %v977_v46 = vadd.f32 %v1676_v43, %v971_v35  ;;  %1917 = vpow2.f32 %v1675_v45  ;;  %v1684_v35 = vld [vmem:[%s2446_s0 + $0x28] sm:$0xff] }
 0xe07   :  { %v974_v38 = vpop.f32.mrb[18].mxu1  ;;  %v1688_v37 = vld [vmem:[%s2447_s1 + $0x50] sm:$0xff] }
 0xe08   :  { %986 = vrot.lane.b32.xlu1 %v984_v36, %s1968_s3  ;;  %v1810_v39 = vpop.f32.mrb[19].mxu1  ;;  %v1681_v47 = vmul.f32 -1.442695, %v977_v46 }
 0xe0a   :  { %1919 = vpow2.f32 %v1681_v47 }
 0xe10   :  { %v1918_v48 = vpop.eup %1917 }
 0xe11   :  { %v894_v49 = vadd.f32 1.0, %v1918_v48 }
 0xe13   :  { %1921 = vrcp.f32 %v894_v49 }
 0xe14   :  { %v1920_v50 = vpop.eup %1919 }
 0xe15   :  { %v981_v51 = vadd.f32 1.0, %v1920_v50 }
 0xe17   :  { %1923 = vrcp.f32 %v981_v51 }
 0xe1d   :  { %v1922_v52 = vpop.eup %1921 }
 0xe21   :  { %v1924_v56 = vpop.eup %1923 }
 0xe76   :  { %v900_v53 = vpop.permute.xlu0 %899 }
 0xe77   :  { %v902_v55 = vmul.f32 %v1922_v52, %v900_v53 }
 0xe79   :  { %904 = vrot.lane.b32.xlu0 %v902_v55, %s1967_s26 }
 0xe7a   :  { %v987_v58 = vpop.permute.xlu1 %986 }
 0xe7b   :  { %v989_v59 = vmul.f32 %v1924_v56, %v987_v58 }
 0xe7d   :  { %991 = vrot.lane.b32.xlu1 %v989_v59, %s1967_s26 }
 0xeeb   :  { %v905_v60 = vpop.permute.xlu0 %904 }
 0xeec   :  { %v907_v61 = vadd.f32 %v1672_v40, %v905_v60 }
 0xeee   :  { %1925 = vtanh.f32 %v907_v61 }
 0xeef   :  { %v992_v62 = vpop.permute.xlu1 %991 }
 0xef0   :  { %v994_v63 = vadd.f32 %v1676_v43, %v992_v62 }
 0xef2   :  { %1927 = vtanh.f32 %v994_v63  ;;  %v1865_v63 = vld [vmem:[%s2444_s2] sm:$0xff]  }
 0xef8   :  { %v1926_v1 = vpop.eup %1925 }
 0xef9   :  { %v909_v2 = vsub.f32 %v2194_v21, %v1926_v1 }
 0xefb   :  { %911 = vrot.lane.b32.xlu0 %v909_v2, %s1970_s15 }
 0xefc   :  { %v1928_v3 = vpop.eup %1927 }
 0xefd   :  { %v996_v4 = vsub.f32 %v2198_v24, %v1928_v3 }
 0xeff   :  { %998 = vrot.lane.b32.xlu1 %v996_v4, %s1970_s15 }
 0xf6d   :  { %v912_v7 = vpop.permute.xlu0 %911 }
 0xf6e   :  { %v914_v8 = vmul.f32 %v1922_v52, %v912_v7 }
 0xf70   :  { %916 = vrot.lane.b32.xlu0 %v914_v8, %s1969_s6 }
 0xf71   :  { %v999_v11 = vpop.permute.xlu1 %998 }
 0xf72   :  { %v1001_v12 = vmul.f32 %v1924_v56, %v999_v11 }
 0xf74   :  { %1003 = vrot.lane.b32.xlu1 %v1001_v12, %s1969_s6 }
 0xfe2   :  { %v917_v13 = vpop.permute.xlu0 %916 }
 0xfe3   :  { %v2236_v14 = vadd.f32 %v1926_v1, %v917_v13  ;;  %v1866_v1 = vld [vmem:[%s2444_s2 + $0x8] sm:$0xff]  }
 0xfe5   :  { %v1023_v15 = vpack.c.bf16 %v2236_v14, %v2236_v14 }
 0xfe6   :  { %v1004_v16 = vpop.permute.xlu1 %1003 }
 0xfe7   :  { %v2240_v17 = vadd.f32 %v1928_v3, %v1004_v16  ;;  %1025 = vrot.lane.b32.xlu0 %v1023_v15, %s1968_s3 }
 0xfe9   :  { %v1110_v18 = vpack.c.bf16 %v2240_v17, %v2240_v17 }
 0xfeb   :  { %1112 = vrot.lane.b32.xlu1 %v1110_v18, %s1968_s3 }
0x1059   :  { %v1026_v19 = vpop.permute.xlu0 %1025 }
0x105a   :  { %1814 = vmatmul.mubr.msk.bf16.vlgmr.msra.gmra.mrb[20].mxu0 %vm63_vm0, %v1026_v19 }
0x105b   :  { %1825 = vmatprep.mubr.msk.bf16.mxu0 %vm1966_vm1, %v1965_v0  ;;  %1824 = vmatpush3.bf16.msra.mxu0 %v1865_v63 }
0x105c   :  { %1835 = vmatprep.subr.bf16.mxu0 %v1965_v0 }
0x105d   :  { %v1113_v20 = vpop.permute.xlu1 %1112 }
0x105e   :  { %1820 = vmatmul.mubr.msk.bf16.vlgmr.msra.gmra.mrb[20].mxu1 %vm63_vm0, %v1113_v20 }
0x105f   :  { %1831 = vmatprep.mubr.msk.bf16.mxu1 %vm1966_vm1, %v1965_v0  ;;  %1830 = vmatpush3.bf16.msra.mxu1 %v1866_v1 }
0x1060   :  { %1841 = vmatprep.subr.bf16.mxu1 %v1965_v0 }
0x112d   :  { %v1070_v22 = vpop.f32.mrb[20].mxu0 }
0x112e   :  { %v1083_v23 = vadd.f32 %v1070_v22, %v2037_v9  ;;  %v1815_v25 = vpop.f32.mrb[21].mxu0  ;;  %v1076_v36 = vadd.f32 %v1684_v35, %v1070_v22 }
0x112f   :  { %v1073_v26 = vpop.f32.mrb[22].mxu0 }
0x1130   :  { %1085 = vrot.lane.b32.xlu0 %v1083_v23, %s1968_s3  ;;  %v1816_v27 = vpop.f32.mrb[23].mxu0  ;;  %v1687_v38 = vmul.f32 -1.442695, %v1076_v36 }
0x1131   :  { %v1157_v28 = vpop.f32.mrb[20].mxu1 }
0x1132   :  { %v1170_v29 = vadd.f32 %v1157_v28, %v2039_v10  ;;  %v1821_v31 = vpop.f32.mrb[21].mxu1  ;;  %v1163_v39 = vadd.f32 %v1688_v37, %v1157_v28  ;;  %1929 = vpow2.f32 %v1687_v38 }
0x1133   :  { %v1160_v32 = vpop.f32.mrb[22].mxu1 }
0x1134   :  { %1172 = vrot.lane.b32.xlu1 %v1170_v29, %s1968_s3  ;;  %v1822_v34 = vpop.f32.mrb[23].mxu1  ;;  %v1693_v40 = vmul.f32 -1.442695, %v1163_v39  ;;  %v1700_v32 = vld [vmem:[%s2447_s1 + $0x48] sm:$0xff] }
0x1136   :  { %1931 = vpow2.f32 %v1693_v40 }
0x113c   :  { %v1930_v42 = vpop.eup %1929 }
0x113d   :  { %v1080_v43 = vadd.f32 1.0, %v1930_v42 }
0x113f   :  { %1933 = vrcp.f32 %v1080_v43 }
0x1140   :  { %v1932_v45 = vpop.eup %1931 }
0x1141   :  { %v1167_v46 = vadd.f32 1.0, %v1932_v45 }
0x1143   :  { %1935 = vrcp.f32 %v1167_v46 }
0x1149   :  { %v1934_v47 = vpop.eup %1933 }
0x114d   :  { %v1936_v50 = vpop.eup %1935 }
0x11a2   :  { %v1086_v48 = vpop.permute.xlu0 %1085 }
0x11a3   :  { %v1088_v49 = vmul.f32 %v1934_v47, %v1086_v48 }
0x11a5   :  { %1090 = vrot.lane.b32.xlu0 %v1088_v49, %s1967_s26 }
0x11a6   :  { %v1173_v51 = vpop.permute.xlu1 %1172 }
0x11a7   :  { %v1175_v52 = vmul.f32 %v1936_v50, %v1173_v51 }
0x11a9   :  { %1177 = vrot.lane.b32.xlu1 %v1175_v52, %s1967_s26 }
0x1217   :  { %v1091_v53 = vpop.permute.xlu0 %1090 }
0x1218   :  { %v1093_v55 = vadd.f32 %v1684_v35, %v1091_v53 }
0x121a   :  { %1937 = vtanh.f32 %v1093_v55 }
0x121b   :  { %v1178_v56 = vpop.permute.xlu1 %1177 }
0x121c   :  { %v1180_v58 = vadd.f32 %v1688_v37, %v1178_v56 }
0x121e   :  { %1939 = vtanh.f32 %v1180_v58 }
0x1224   :  { %v1938_v59 = vpop.eup %1937 }
0x1225   :  { %v1095_v60 = vsub.f32 %v2236_v14, %v1938_v59 }
0x1227   :  { %1097 = vrot.lane.b32.xlu0 %v1095_v60, %s1970_s15  ;;  %v1868_v60 = vld [vmem:[%s2444_s2 + $0x8] sm:$0xff]  }
0x1228   :  { %v1940_v61 = vpop.eup %1939 }
0x1229   :  { %v1182_v62 = vsub.f32 %v2240_v17, %v1940_v61 }
0x122b   :  { %1184 = vrot.lane.b32.xlu1 %v1182_v62, %s1970_s15 }
0x1299   :  { %v1098_v2 = vpop.permute.xlu0 %1097 }
0x129a   :  { %v1100_v3 = vmul.f32 %v1934_v47, %v1098_v2 }
0x129c   :  { %1102 = vrot.lane.b32.xlu0 %v1100_v3, %s1969_s6 }
0x129d   :  { %v1185_v4 = vpop.permute.xlu1 %1184 }
0x129e   :  { %v1187_v5 = vmul.f32 %v1936_v50, %v1185_v4 }
0x12a0   :  { %1189 = vrot.lane.b32.xlu1 %v1187_v5, %s1969_s6 }
0x130e   :  { %v1103_v6 = vpop.permute.xlu0 %1102 }
0x130f   :  { %v2278_v7 = vadd.f32 %v1938_v59, %v1103_v6  ;;  %v1867_v59 = vld [vmem:[%s2444_s2] sm:$0xff]  }
0x1311   :  { %v1209_v8 = vpack.c.bf16 %v2278_v7, %v2278_v7 }
0x1312   :  { %v1190_v11 = vpop.permute.xlu1 %1189 }
0x1313   :  { %v2282_v12 = vadd.f32 %v1940_v61, %v1190_v11  ;;  %1211 = vrot.lane.b32.xlu0 %v1209_v8, %s1968_s3 }
0x1315   :  { %v1296_v13 = vpack.c.bf16 %v2282_v12, %v2282_v12 }
0x1317   :  { %1298 = vrot.lane.b32.xlu1 %v1296_v13, %s1968_s3 }
0x1385   :  { %v1212_v15 = vpop.permute.xlu0 %1211 }
0x1386   :  { %1826 = vmatmul.mubr.msk.bf16.vlgmr.msra.gmra.mrb[24].mxu0 %vm63_vm0, %v1212_v15 }
0x1387   :  { %1837 = vmatprep.mubr.msk.bf16.mxu0 %vm1966_vm1, %v1965_v0  ;;  %1836 = vmatpush3.bf16.msra.mxu0 %v1867_v59 }
0x1389   :  { %v1299_v16 = vpop.permute.xlu1 %1298 }
0x138a   :  { %1832 = vmatmul.mubr.msk.bf16.vlgmr.msra.gmra.mrb[24].mxu1 %vm63_vm0, %v1299_v16 }
0x138b   :  { %1843 = vmatprep.mubr.msk.bf16.mxu1 %vm1966_vm1, %v1965_v0  ;;  %v1696_v0 = vld [vmem:[%s2446_s0 + $0x30] sm:$0xff]  ;;  %1842 = vmatpush3.bf16.msra.mxu1 %v1868_v60 }
0x1459   :  { %v1256_v18 = vpop.f32.mrb[24].mxu0 }
0x145a   :  { %v1269_v19 = vadd.f32 %v1256_v18, %v2037_v9  ;;  %v1827_v20 = vpop.f32.mrb[25].mxu0  ;;  %v1262_v31 = vadd.f32 %v1696_v0, %v1256_v18 }
0x145b   :  { %v1259_v22 = vpop.f32.mrb[26].mxu0 }
0x145c   :  { %1271 = vrot.lane.b32.xlu0 %v1269_v19, %s1968_s3  ;;  %v1828_v23 = vpop.f32.mrb[27].mxu0  ;;  %v1699_v34 = vmul.f32 -1.442695, %v1262_v31 }
0x145d   :  { %v1343_v25 = vpop.f32.mrb[24].mxu1 }
0x145e   :  { %v1356_v26 = vadd.f32 %v1343_v25, %v2039_v10  ;;  %v1833_v27 = vpop.f32.mrb[25].mxu1  ;;  %v1349_v35 = vadd.f32 %v1700_v32, %v1343_v25  ;;  %1941 = vpow2.f32 %v1699_v34 }
0x145f   :  { %v1346_v28 = vpop.f32.mrb[26].mxu1 }
0x1460   :  { %1358 = vrot.lane.b32.xlu1 %v1356_v26, %s1968_s3  ;;  %v1834_v29 = vpop.f32.mrb[27].mxu1  ;;  %v1705_v36 = vmul.f32 -1.442695, %v1349_v35  ;;  %v1708_v28 = vld [vmem:[%s2446_s0 + $0x38] sm:$0xff] }
0x1462   :  { %1943 = vpow2.f32 %v1705_v36 }
0x1468   :  { %v1942_v37 = vpop.eup %1941 }
0x1469   :  { %v1266_v38 = vadd.f32 1.0, %v1942_v37 }
0x146b   :  { %1945 = vrcp.f32 %v1266_v38 }
0x146c   :  { %v1944_v39 = vpop.eup %1943 }
0x146d   :  { %v1353_v40 = vadd.f32 1.0, %v1944_v39 }
0x146f   :  { %1947 = vrcp.f32 %v1353_v40 }
0x1475   :  { %v1946_v42 = vpop.eup %1945 }
0x1479   :  { %v1948_v46 = vpop.eup %1947 }
0x14ce   :  { %v1272_v43 = vpop.permute.xlu0 %1271 }
0x14cf   :  { %v1274_v45 = vmul.f32 %v1946_v42, %v1272_v43 }
0x14d1   :  { %1276 = vrot.lane.b32.xlu0 %v1274_v45, %s1967_s26 }
0x14d2   :  { %v1359_v47 = vpop.permute.xlu1 %1358 }
0x14d3   :  { %v1361_v48 = vmul.f32 %v1948_v46, %v1359_v47 }
0x14d5   :  { %1363 = vrot.lane.b32.xlu1 %v1361_v48, %s1967_s26 }
0x1543   :  { %v1277_v49 = vpop.permute.xlu0 %1276 }
0x1544   :  { %v1279_v50 = vadd.f32 %v1696_v0, %v1277_v49 }
0x1546   :  { %1949 = vtanh.f32 %v1279_v50 }
0x1547   :  { %v1364_v51 = vpop.permute.xlu1 %1363 }
0x1548   :  { %v1366_v52 = vadd.f32 %v1700_v32, %v1364_v51 }
0x154a   :  { %1951 = vtanh.f32 %v1366_v52 }
0x1550   :  { %v1950_v53 = vpop.eup %1949 }
0x1551   :  { %v1281_v55 = vsub.f32 %v2278_v7, %v1950_v53 }
0x1553   :  { %1283 = vrot.lane.b32.xlu0 %v1281_v55, %s1970_s15 }
0x1554   :  { %v1952_v56 = vpop.eup %1951 }
0x1555   :  { %v1368_v58 = vsub.f32 %v2282_v12, %v1952_v56 }
0x1557   :  { %1370 = vrot.lane.b32.xlu1 %v1368_v58, %s1970_s15 }
0x15c5   :  { %v1284_v61 = vpop.permute.xlu0 %1283 }
0x15c6   :  { %v1286_v62 = vmul.f32 %v1946_v42, %v1284_v61 }
0x15c8   :  { %1288 = vrot.lane.b32.xlu0 %v1286_v62, %s1969_s6 }
0x15c9   :  { %v1371_v63 = vpop.permute.xlu1 %1370 }
0x15ca   :  { %v1373_v1 = vmul.f32 %v1948_v46, %v1371_v63 }
0x15cc   :  { %1375 = vrot.lane.b32.xlu1 %v1373_v1, %s1969_s6 }
0x163a   :  { %v1289_v2 = vpop.permute.xlu0 %1288 }
0x163b   :  { %v2318_v3 = vadd.f32 %v1950_v53, %v1289_v2 }
0x163d   :  { %v1395_v4 = vpack.c.bf16 %v2318_v3, %v2318_v3 }
0x163e   :  { %v1376_v5 = vpop.permute.xlu1 %1375 }
0x163f   :  { %v2322_v6 = vadd.f32 %v1952_v56, %v1376_v5  ;;  %1397 = vrot.lane.b32.xlu0 %v1395_v4, %s1968_s3 }
0x1641   :  { %v1481_v8 = vpack.c.bf16 %v2322_v6, %v2322_v6 }
0x1643   :  { %1483 = vrot.lane.b32.xlu1 %v1481_v8, %s1968_s3 }
0x16b1   :  { %v1398_v11 = vpop.permute.xlu0 %1397 }
0x16b2   :  { %1838 = vmatmul.mubr.msk.bf16.vlgmr.msra.gmra.mrb[28].mxu0 %vm63_vm0, %v1398_v11 }
0x16b5   :  { %v1484_v13 = vpop.permute.xlu1 %1483 }
0x16b6   :  { %1844 = vmatmul.mubr.msk.bf16.vlgmr.msra.gmra.mrb[28].mxu1 %vm63_vm0, %v1484_v13 }
0x1785   :  { %v1442_v15 = vpop.f32.mrb[28].mxu0 }
0x1786   :  { %v1455_v16 = vadd.f32 %v1442_v15, %v2037_v9  ;;  %v1839_v18 = vpop.f32.mrb[29].mxu0  ;;  %v1448_v29 = vadd.f32 %v1708_v28, %v1442_v15  ;;  %v1712_v9 = vld [vmem:[%s2447_s1 + $0x40] sm:$0xff] }
0x1787   :  { %v1445_v19 = vpop.f32.mrb[30].mxu0 }
0x1788   :  { %1457 = vrot.lane.b32.xlu0 %v1455_v16, %s1968_s3  ;;  %v1840_v20 = vpop.f32.mrb[31].mxu0  ;;  %v1711_v0 = vmul.f32 -1.442695, %v1448_v29 }
0x1789   :  { %v1528_v22 = vpop.f32.mrb[28].mxu1 }
0x178a   :  { %v1541_v23 = vadd.f32 %v1528_v22, %v2039_v10  ;;  %v1845_v25 = vpop.f32.mrb[29].mxu1  ;;  %v1534_v31 = vadd.f32 %v1712_v9, %v1528_v22  ;;  %1953 = vpow2.f32 %v1711_v0 }
0x178b   :  { %v1531_v26 = vpop.f32.mrb[30].mxu1 }
0x178c   :  { %1543 = vrot.lane.b32.xlu1 %v1541_v23, %s1968_s3  ;;  %v1846_v27 = vpop.f32.mrb[31].mxu1  ;;  %v1717_v32 = vmul.f32 -1.442695, %v1534_v31 }
0x178e   :  { %1955 = vpow2.f32 %v1717_v32 }
0x1794   :  { %v1954_v10 = vpop.eup %1953 }
0x1795   :  { %v1452_v34 = vadd.f32 1.0, %v1954_v10 }
0x1797   :  { %1957 = vrcp.f32 %v1452_v34 }
0x1798   :  { %v1956_v35 = vpop.eup %1955 }
0x1799   :  { %v1538_v36 = vadd.f32 1.0, %v1956_v35 }
0x179b   :  { %1959 = vrcp.f32 %v1538_v36 }
0x17a1   :  { %v1958_v37 = vpop.eup %1957 }
0x17a5   :  { %v1960_v40 = vpop.eup %1959 }
0x17fa   :  { %v1458_v38 = vpop.permute.xlu0 %1457 }
0x17fb   :  { %v1460_v39 = vmul.f32 %v1958_v37, %v1458_v38 }
0x17fd   :  { %1462 = vrot.lane.b32.xlu0 %v1460_v39, %s1967_s26 }
0x17fe   :  { %v1544_v42 = vpop.permute.xlu1 %1543 }
0x17ff   :  { %v1546_v43 = vmul.f32 %v1960_v40, %v1544_v42 }
0x1801   :  { %1548 = vrot.lane.b32.xlu1 %v1546_v43, %s1967_s26 }
0x186f   :  { %v1463_v45 = vpop.permute.xlu0 %1462 }
0x1870   :  { %v1465_v46 = vadd.f32 %v1708_v28, %v1463_v45 }
0x1872   :  { %1961 = vtanh.f32 %v1465_v46 }
0x1873   :  { %v1549_v47 = vpop.permute.xlu1 %1548 }
0x1874   :  { %v1551_v48 = vadd.f32 %v1712_v9, %v1549_v47 }
0x1876   :  { %1963 = vtanh.f32 %v1551_v48 }
0x187c   :  { %v1962_v49 = vpop.eup %1961 }
0x187d   :  { %v1467_v50 = vsub.f32 %v2318_v3, %v1962_v49 }
0x187f   :  { %1469 = vrot.lane.b32.xlu0 %v1467_v50, %s1970_s15 }
0x1880   :  { %v1964_v51 = vpop.eup %1963 }
0x1881   :  { %v1553_v52 = vsub.f32 %v2322_v6, %v1964_v51 }
0x1883   :  { %1555 = vrot.lane.b32.xlu1 %v1553_v52, %s1970_s15 }
0x18f1   :  { %v1470_v53 = vpop.permute.xlu0 %1469 }
0x18f2   :  { %v1472_v55 = vmul.f32 %v1958_v37, %v1470_v53 }
0x18f4   :  { %1474 = vrot.lane.b32.xlu0 %v1472_v55, %s1969_s6 }
0x18f5   :  { %v1556_v56 = vpop.permute.xlu1 %1555 }
0x18f6   :  { %v1558_v58 = vmul.f32 %v1960_v40, %v1556_v56 }
0x18f8   :  { %1560 = vrot.lane.b32.xlu1 %v1558_v58, %s1969_s6  ;;  %265 = vrot.lane.b32.xlu0 %v2068_v54, %s1968_s3 }
0x18fc   :  { %270 = vrot.lane.b32.xlu1 %v2072_v57, %s1968_s3  ;;  %450 = vrot.lane.b32.xlu0 %v2110_v41, %s1968_s3 }
0x1900   :  { %456 = vrot.lane.b32.xlu1 %v2114_v44, %s1968_s3  ;;  %636 = vrot.lane.b32.xlu0 %v2152_v30, %s1968_s3 }
0x1904   :  { %642 = vrot.lane.b32.xlu1 %v2156_v33, %s1968_s3  ;;  %822 = vrot.lane.b32.xlu0 %v2194_v21, %s1968_s3 }
0x1908   :  { %828 = vrot.lane.b32.xlu1 %v2198_v24, %s1968_s3  ;;  %1008 = vrot.lane.b32.xlu0 %v2236_v14, %s1968_s3 }
0x190c   :  { %1014 = vrot.lane.b32.xlu1 %v2240_v17, %s1968_s3  ;;  %1194 = vrot.lane.b32.xlu0 %v2278_v7, %s1968_s3 }
0x1910   :  { %1200 = vrot.lane.b32.xlu1 %v2282_v12, %s1968_s3  ;;  %1380 = vrot.lane.b32.xlu0 %v2318_v3, %s1968_s3 }
0x1914   :  { %1386 = vrot.lane.b32.xlu1 %v2322_v6, %s1968_s3 }
0x1966   :  { %v1475_v54 = vpop.permute.xlu0 %1474 }
0x1967   :  { %v1477_v57 = vadd.f32 %v1962_v49, %v1475_v54 }
0x1969   :  { %1565 = vrot.lane.b32.xlu0 %v1477_v57, %s1968_s3 }
0x196a   :  { %v1561_v41 = vpop.permute.xlu1 %1560  ;;  %v266_v44 = vpop.permute.xlu0 %265 }
0x196b   :  { %v1563_v30 = vadd.f32 %v1964_v51, %v1561_v41  ;;  %268 = vst.msk [vmem:[%s2448_s4] sm:$0xff] %vm63_vm0, %v266_v44 }
0x196d   :  { %1571 = vrot.lane.b32.xlu1 %v1563_v30, %s1968_s3 }
0x196e   :  { %v271_v33 = vpop.permute.xlu1 %270  ;;  %v451_v21 = vpop.permute.xlu0 %450 }
0x196f   :  { %1635 = vst.msk [vmem:[%s2449_s5 + $0x38] sm:$0xff] %vm63_vm0, %v271_v33  ;;  %1646 = vst.msk [vmem:[%s2448_s4 + $0x8] sm:$0xff] %vm63_vm0, %v451_v21 }
0x1972   :  { %v457_v24 = vpop.permute.xlu1 %456  ;;  %v637_v14 = vpop.permute.xlu0 %636 }
0x1973   :  { %1647 = vst.msk [vmem:[%s2449_s5 + $0x30] sm:$0xff] %vm63_vm0, %v457_v24  ;;  %1658 = vst.msk [vmem:[%s2448_s4 + $0x10] sm:$0xff] %vm63_vm0, %v637_v14 }
0x1976   :  { %v643_v17 = vpop.permute.xlu1 %642  ;;  %v823_v7 = vpop.permute.xlu0 %822 }
0x1977   :  { %1659 = vst.msk [vmem:[%s2449_s5 + $0x28] sm:$0xff] %vm63_vm0, %v643_v17  ;;  %1670 = vst.msk [vmem:[%s2448_s4 + $0x18] sm:$0xff] %vm63_vm0, %v823_v7 }
0x197a   :  { %v829_v12 = vpop.permute.xlu1 %828  ;;  %v1009_v59 = vpop.permute.xlu0 %1008 }
0x197b   :  { %1671 = vst.msk [vmem:[%s2449_s5 + $0x20] sm:$0xff] %vm63_vm0, %v829_v12  ;;  %1682 = vst.msk [vmem:[%s2448_s4 + $0x20] sm:$0xff] %vm63_vm0, %v1009_v59 }
0x197e   :  { %v1015_v60 = vpop.permute.xlu1 %1014  ;;  %v1195_v61 = vpop.permute.xlu0 %1194 }
0x197f   :  { %1683 = vst.msk [vmem:[%s2449_s5 + $0x18] sm:$0xff] %vm63_vm0, %v1015_v60  ;;  %1694 = vst.msk [vmem:[%s2448_s4 + $0x28] sm:$0xff] %vm63_vm0, %v1195_v61 }
0x1982   :  { %v1201_v62 = vpop.permute.xlu1 %1200  ;;  %v1381_v63 = vpop.permute.xlu0 %1380 }
0x1983   :  { %1695 = vst.msk [vmem:[%s2449_s5 + $0x10] sm:$0xff] %vm63_vm0, %v1201_v62  ;;  %1706 = vst.msk [vmem:[%s2448_s4 + $0x30] sm:$0xff] %vm63_vm0, %v1381_v63 }
0x1986   :  { %v1387_v1 = vpop.permute.xlu1 %1386 }
0x1987   :  { %1707 = vst.msk [vmem:[%s2449_s5 + $0x8] sm:$0xff] %vm63_vm0, %v1387_v1 }
0x19db   :  { %v1566_v2 = vpop.permute.xlu0 %1565 }
0x19dc   :  { %1718 = vst.msk [vmem:[%s2448_s4 + $0x38] sm:$0xff] %vm63_vm0, %v1566_v2  ;;  %1575 = vst.msk [vmem:[#allocation2] sm:$0xff] %vm63_vm0, %v1566_v2 }
0x19df   :  { %v1572_v3 = vpop.permute.xlu1 %1571 }
0x19e0   :  { %1574 = vst.msk [vmem:[%s2449_s5] sm:$0xff] %vm63_vm0, %v1572_v3  ;;  %1576 = vst.msk [vmem:[#allocation3] sm:$0xff] %vm63_vm0, %v1572_v3 }

</bundles_post_ra>
